<compile_context>
chip_gen: v7x
topology: tpu7x:2x2x1
jax: 0.10.0
libtpu: 0.0.40
codegen_flags: <defaults>
</compile_context>

<pallas_src>
import functools

import jax
import jax.numpy as jnp
from jax.experimental import pallas as pl
from jax.experimental.pallas import tpu as pltpu


def _round_up(x, m):
    return (x + m - 1) // m * m


def _sigmoid(x):
    # sigmoid(x) == 0.5 * (tanh(x / 2) + 1): a single EUP push per gate,
    # no divide on the VPU.
    return 0.5 * (jnp.tanh(0.5 * x) + 1.0)


def _lstm_kernel(x_ref, w_ref, u_ref, b_ref,
                 seq_ref, h_ref, c_ref,
                 h_scr, c_scr, pg_scr,
                 *, t_blk, seq_len, seq_pad, hidden_pad, matmul_dtype, unroll):
    """One grid step == one (batch-tile, time-block) tile.

    x_ref  : (t_blk, B, I)       time-major input block
    w_ref  : (I, 4*Hp)           input projection, gate order i|f|c|o, zero-pad
    u_ref  : (Hp, 4*Hp)          recurrent projection, zero-padded rows/cols
    b_ref  : (1, 4*Hp)           fused bias (f32), zero-padded
    seq_ref: (t_blk, B, Hp)      hidden_seq block for this tile
    h_ref  : (B, Hp)             final hidden state (written on last block)
    c_ref  : (B, Hp)             final cell state   (written on last block)
    h_scr, c_scr : (B, Hp) VMEM  recurrent state carried across time blocks
    pg_scr : (t_blk*B, 4*Hp)     hoisted pre-gates  x@W + b  for this block

    NOTE: correctness of the h_scr/c_scr carry relies on the time axis being
    the last, "arbitrary" grid dimension and on the tb==0 re-init per batch
    tile.  Do not reorder grid axes or mark time "parallel".
    """
    tb = pl.program_id(1)          # time-block index (sequential)
    Hp = hidden_pad
    B = h_scr.shape[0]

    @pl.when(tb == 0)
    def _():
        h_scr[...] = jnp.zeros_like(h_scr)
        c_scr[...] = jnp.zeros_like(c_scr)

    # ---- Hoisted input projection: one tall (t_blk*B, I) @ (I, 4*Hp) MXU
    # matmul per time block, off the serial critical path. Bias added once. ----
    x_blk = x_ref[...].reshape(t_blk * B, x_ref.shape[-1]).astype(matmul_dtype)
    pg_scr[...] = (jnp.dot(x_blk, w_ref[...],
                           preferred_element_type=jnp.float32)
                   + b_ref[...])

    def step(s, carry):
        h_prev, c_prev = carry
        row = pl.multiple_of(s * B, 8)                      # sublane-aligned
        # Serial critical path: only h_prev @ U (K = Hp) + activations.
        gates = pg_scr[pl.ds(row, B), :] + jnp.dot(
            h_prev.astype(matmul_dtype), u_ref[...],
            preferred_element_type=jnp.float32)
        # Consume i/f/g into c_new before materializing o_t (vreg pressure).
        i_t = _sigmoid(gates[:, 0 * Hp:1 * Hp])             # lane-aligned
        f_t = _sigmoid(gates[:, 1 * Hp:2 * Hp])
        g_t = jnp.tanh(gates[:, 2 * Hp:3 * Hp])
        c_new = f_t * c_prev + i_t * g_t
        o_t = _sigmoid(gates[:, 3 * Hp:4 * Hp])
        h_new = o_t * jnp.tanh(c_new)
        if seq_pad != seq_len:
            # Steps beyond the real sequence length must not advance the state.
            keep = (tb * t_blk + s) < seq_len
            h_new = jnp.where(keep, h_new, h_prev)
            c_new = jnp.where(keep, c_new, c_prev)
        seq_ref[s] = h_new.astype(seq_ref.dtype)
        return h_new, c_new

    h_T, c_T = jax.lax.fori_loop(0, t_blk, step, (h_scr[...], c_scr[...]),
                                 unroll=unroll)
    h_scr[...] = h_T
    c_scr[...] = c_T

    # Final-state outputs: constant block index along time -> only the last
    # block's write matters; skip redundant per-step stores.
    @pl.when(tb == pl.num_programs(1) - 1)
    def _():
        h_ref[...] = h_T.astype(h_ref.dtype)
        c_ref[...] = c_T.astype(c_ref.dtype)


def pack_params(params, hidden_pad, matmul_dtype):
    """Pad to lane-aligned Hp and stack per-gate weights along the gate axis."""
    hidden = params["u_i"].shape[0]
    pad_h = hidden_pad - hidden

    def pad_cols(w):                      # (*, H) -> (*, Hp)
        return jnp.pad(w.astype(jnp.float32), ((0, 0), (0, pad_h)))

    # Gate order i, f, c, o (matches the kernel's slice order).
    w = jnp.concatenate([pad_cols(params[f"w_{g}"]) for g in "ifco"],
                        axis=1)                                    # (I, 4*Hp)
    u = jnp.concatenate(
        [jnp.pad(pad_cols(params[f"u_{g}"]), ((0, pad_h), (0, 0)))
         for g in "ifco"], axis=1)                                 # (Hp, 4*Hp)
    b = jnp.concatenate(
        [jnp.pad(params[f"b_{g}"].astype(jnp.float32), (0, pad_h))
         for g in "ifco"], axis=0)[None, :]                        # (1, 4*Hp)
    return w.astype(matmul_dtype), u.astype(matmul_dtype), b


def custom_lstm_forward(X, params, *, time_block=16, unroll=True,
                        matmul_dtype=jnp.bfloat16,
                        single_buffer_weights=False,
                        vmem_limit_bytes=64 * 1024 * 1024,
                        return_time_major=False):
    """X: (bs, seq, input_size) float32.  Returns (hidden_seq, (h_T, c_T)).

    time_block / unroll: sweep per generation (smaller t_blk on v7x, 64 MiB
    VMEM).  matmul_dtype=jnp.float32 gives a strict-precision path.
    """
    bs, seq, input_size = X.shape
    hidden = params["u_i"].shape[0]

    hidden_pad = _round_up(hidden, 128)               # lane-aligned gate slices
    t_blk = max(1, min(time_block, seq))              # timesteps per grid step
    seq_pad = _round_up(seq, t_blk)
    bs_pad = _round_up(bs, 8)                         # f32 sublane
    if bs_pad >= 16:
        # >=2 batch tiles so the "parallel" axis can feed both v7x TensorCores;
        # 64-row cap keeps the per-step gate working set inside the vreg file.
        block_b = min(64, _round_up(bs_pad // 2, 8))
    else:
        block_b = bs_pad
    bs_pad = _round_up(bs_pad, block_b)

    w, u, b = pack_params(params, hidden_pad, matmul_dtype)

    # Time-major layout so per-step indexing inside the kernel is a clean
    # dynamic index along the leading axis.
    X_t = jnp.transpose(X.astype(jnp.float32), (1, 0, 2))   # (seq, bs, I)
    X_t = jnp.pad(X_t, ((0, seq_pad - seq), (0, bs_pad - bs), (0, 0)))

    kernel = functools.partial(
        _lstm_kernel, t_blk=t_blk, seq_len=seq, seq_pad=seq_pad,
        hidden_pad=hidden_pad, matmul_dtype=matmul_dtype, unroll=unroll)

    grid = (bs_pad // block_b, seq_pad // t_blk)

    # Constant-index weight/bias blocks: optionally single-buffer on v7x to
    # halve their VMEM residency.
    const_kw = ({"pipeline_mode": pl.Buffered(1)} if single_buffer_weights
                else {})

    hidden_seq, h_T, c_T = pl.pallas_call(
        kernel,
        grid=grid,
        in_specs=[
            pl.BlockSpec((t_blk, block_b, input_size),
                         lambda bb, tb: (tb, bb, 0)),
            pl.BlockSpec((input_size, 4 * hidden_pad),
                         lambda bb, tb: (0, 0), **const_kw),
            pl.BlockSpec((hidden_pad, 4 * hidden_pad),
                         lambda bb, tb: (0, 0), **const_kw),
            pl.BlockSpec((1, 4 * hidden_pad),
                         lambda bb, tb: (0, 0), **const_kw),
        ],
        out_specs=[
            pl.BlockSpec((t_blk, block_b, hidden_pad),
                         lambda bb, tb: (tb, bb, 0)),
            pl.BlockSpec((block_b, hidden_pad), lambda bb, tb: (bb, 0)),
            pl.BlockSpec((block_b, hidden_pad), lambda bb, tb: (bb, 0)),
        ],
        out_shape=[
            jax.ShapeDtypeStruct((seq_pad, bs_pad, hidden_pad), jnp.float32),
            jax.ShapeDtypeStruct((bs_pad, hidden_pad), jnp.float32),
            jax.ShapeDtypeStruct((bs_pad, hidden_pad), jnp.float32),
        ],
        scratch_shapes=[
            pltpu.VMEM((block_b, hidden_pad), jnp.float32),          # h carry
            pltpu.VMEM((block_b, hidden_pad), jnp.float32),          # c carry
            pltpu.VMEM((t_blk * block_b, 4 * hidden_pad), jnp.float32),  # x@W+b
        ],
        compiler_params=pltpu.CompilerParams(
            # Batch tiles are independent (megacore-shardable); the time
            # recurrence must stay sequential ("arbitrary", innermost).
            dimension_semantics=("parallel", "arbitrary"),
            vmem_limit_bytes=vmem_limit_bytes),
    )(X_t, w, u, b)

    hidden_seq = hidden_seq[:seq, :bs, :hidden]
    h_T = h_T[:bs, :hidden]
    c_T = c_T[:bs, :hidden]
    if return_time_major:
        return hidden_seq, (h_T, c_T)
    return jnp.transpose(hidden_seq, (1, 0, 2)), (h_T, c_T)


def init_params(key, input_size, hidden_size):
    """Match the nn.Module init(): uniform(-std, std), std = 1/sqrt(hidden)."""
    std = 1.0 / jnp.sqrt(jnp.float32(hidden_size))
    names = ["w_i", "u_i", "b_i", "w_f", "u_f", "b_f",
             "w_c", "u_c", "b_c", "w_o", "u_o", "b_o"]
    shapes = {"w": (input_size, hidden_size),
              "u": (hidden_size, hidden_size),
              "b": (hidden_size,)}
    ks = jax.random.split(key, len(names))
    return {n: jax.random.uniform(k, shapes[n[0]], jnp.float32,
                                  minval=-std, maxval=std)
            for n, k in zip(names, ks)}


def _reference_lstm(X, params):
    """Pure-JAX reference mirroring the PyTorch per-gate loop."""
    bs, seq, _ = X.shape
    hidden = params["u_i"].shape[0]

    def step(carry, x_t):
        h, c = carry
        i = jax.nn.sigmoid(x_t @ params["w_i"] + h @ params["u_i"] + params["b_i"])
        f = jax.nn.sigmoid(x_t @ params["w_f"] + h @ params["u_f"] + params["b_f"])
        g = jnp.tanh(x_t @ params["w_c"] + h @ params["u_c"] + params["b_c"])
        o = jax.nn.sigmoid(x_t @ params["w_o"] + h @ params["u_o"] + params["b_o"])
        c = f * c + i * g
        h = o * jnp.tanh(c)
        return (h, c), h

    h0 = jnp.zeros((bs, hidden), jnp.float32)
    c0 = jnp.zeros((bs, hidden), jnp.float32)
    (hT, cT), hs = jax.lax.scan(step, (h0, c0), jnp.transpose(X, (1, 0, 2)))
    return jnp.transpose(hs, (1, 0, 2)), (hT, cT)


if __name__ == "__main__":
    batch, seq, input_size, hidden = 4, 8, 16, 32

    key = jax.random.PRNGKey(0)
    k_param, k_x = jax.random.split(key)
    params = init_params(k_param, input_size, hidden)
    X = jax.random.normal(k_x, (batch, seq, input_size), jnp.float32)

    ref_seq, (ref_h, ref_c) = _reference_lstm(X, params)

    # Strict path: f32 MXU operands -> tight tolerance vs. the f32 reference.
    seq_f32, (h_f32, c_f32) = custom_lstm_forward(
        X, params, matmul_dtype=jnp.float32)
    jax.block_until_ready((seq_f32, h_f32, c_f32))
    assert seq_f32.shape == (batch, seq, hidden)
    assert h_f32.shape == (batch, hidden) and c_f32.shape == (batch, hidden)
    assert jnp.allclose(seq_f32, ref_seq, atol=2e-4, rtol=2e-4)
    assert jnp.allclose(h_f32, ref_h, atol=2e-4, rtol=2e-4)
    assert jnp.allclose(c_f32, ref_c, atol=2e-4, rtol=2e-4)

    # Default (fast) path: bf16 MXU operands, f32 accumulation & state math;
    # tolerance loosened accordingly (bf16 has ~3 decimal digits).
    hidden_seq, (h_T, c_T) = custom_lstm_forward(X, params)
    jax.block_until_ready((hidden_seq, h_T, c_T))
    assert hidden_seq.shape == (batch, seq, hidden)
    assert jnp.allclose(hidden_seq, ref_seq, atol=3e-2, rtol=3e-2)
    assert jnp.allclose(h_T, ref_h, atol=3e-2, rtol=3e-2)
    assert jnp.allclose(c_T, ref_c, atol=3e-2, rtol=3e-2)

    print("KERNEL_OK")
</pallas_src>

<mosaic_0001>
module attributes {stable_mosaic.version = 11 : i64} {
  func.func @_lstm_kernel(%arg0: i32, %arg1: i32, %arg2: memref<8x8x16xf32, #tpu.memory_space<vmem>>, %arg3: memref<16x512xf32, #tpu.memory_space<vmem>>, %arg4: memref<128x512xf32, #tpu.memory_space<vmem>>, %arg5: memref<1x512xf32, #tpu.memory_space<vmem>>, %arg6: memref<8x8x128xf32, #tpu.memory_space<vmem>>, %arg7: memref<8x128xf32, #tpu.memory_space<vmem>>, %arg8: memref<8x128xf32, #tpu.memory_space<vmem>>, %arg9: memref<8x128xf32, #tpu.memory_space<vmem>>, %arg10: memref<8x128xf32, #tpu.memory_space<vmem>>, %arg11: memref<64x512xf32, #tpu.memory_space<vmem>>) attributes {dimension_semantics = [#tpu.dimension_semantics<parallel>, #tpu.dimension_semantics<arbitrary>], iteration_bounds = array<i64: 1, 1>, scalar_prefetch = 0 : i64, scratch_operands = 3 : i64, tpu.core_type = #tpu.core_type<tc>, window_params = [{transform_indices = @transform_0, window_bounds = array<i64: 8, 8, 16>}, {pipeline_mode = #tpu.pipeline_mode<synchronous>, transform_indices = @transform_1, window_bounds = array<i64: 16, 512>}, {pipeline_mode = #tpu.pipeline_mode<synchronous>, transform_indices = @transform_2, window_bounds = array<i64: 128, 512>}, {pipeline_mode = #tpu.pipeline_mode<synchronous>, transform_indices = @transform_3, window_bounds = array<i64: 1, 512>}, {transform_indices = @transform_4, window_bounds = array<i64: 8, 8, 128>}, {transform_indices = @transform_5, window_bounds = array<i64: 8, 128>}, {transform_indices = @transform_6, window_bounds = array<i64: 8, 128>}]} {
    %c0_i32 = arith.constant 0 : i32
    %0 = arith.cmpi eq, %arg1, %c0_i32 : i32
    %1 = arith.extui %0 : i1 to i32
    %c0_i32_0 = arith.constant 0 : i32
    %2 = arith.cmpi ne, %1, %c0_i32_0 : i32
    scf.if %2 {
      %cst_148 = arith.constant 0.000000e+00 : f32
      %354 = vector.broadcast %cst_148 : f32 to vector<8x128xf32>
      %c0_149 = arith.constant 0 : index
      %c0_150 = arith.constant 0 : index
      %355 = vector.load %arg9[%c0_149, %c0_150] : memref<8x128xf32, #tpu.memory_space<vmem>>, vector<8x128xf32>
      tpu.vector_store %arg9[%c0_149, %c0_150], %354 {strides = array<i32>} : memref<8x128xf32, #tpu.memory_space<vmem>>, vector<8x128xf32>,
      %cst_151 = arith.constant 0.000000e+00 : f32
      %356 = vector.broadcast %cst_151 : f32 to vector<8x128xf32>
      %c0_152 = arith.constant 0 : index
      %c0_153 = arith.constant 0 : index
      %357 = vector.load %arg10[%c0_152, %c0_153] : memref<8x128xf32, #tpu.memory_space<vmem>>, vector<8x128xf32>
      tpu.vector_store %arg10[%c0_152, %c0_153], %356 {strides = array<i32>} : memref<8x128xf32, #tpu.memory_space<vmem>>, vector<8x128xf32>,
    } else {
    }
    %c0 = arith.constant 0 : index
    %c0_1 = arith.constant 0 : index
    %c0_2 = arith.constant 0 : index
    %3 = vector.load %arg2[%c0, %c0_1, %c0_2] : memref<8x8x16xf32, #tpu.memory_space<vmem>>, vector<8x8x16xf32>
    %4 = vector.shape_cast %3 : vector<8x8x16xf32> to vector<64x16xf32>
    %c0_3 = arith.constant 0 : index
    %c0_4 = arith.constant 0 : index
    %5 = vector.load %arg3[%c0_3, %c0_4] : memref<16x512xf32, #tpu.memory_space<vmem>>, vector<16x512xf32>
    %cst = arith.constant dense<0.000000e+00> : vector<64x512xf32>
    %6 = tpu.matmul %4, %5, %cst {dimension_numbers = #tpu.dot_dimension_numbers<[1], [0], [0], [1], [0, 0, 1, 1], [], []>} : vector<64x16xf32>, vector<16x512xf32>, vector<64x512xf32> -> vector<64x512xf32>
    %c0_5 = arith.constant 0 : index
    %c0_6 = arith.constant 0 : index
    %7 = vector.load %arg5[%c0_5, %c0_6] : memref<1x512xf32, #tpu.memory_space<vmem>>, vector<1x512xf32>
    %8 = vector.broadcast %7 : vector<1x512xf32> to vector<64x512xf32>
    %9 = arith.addf %6, %8 : vector<64x512xf32>
    %c0_7 = arith.constant 0 : index
    %c0_8 = arith.constant 0 : index
    %10 = vector.load %arg11[%c0_7, %c0_8] : memref<64x512xf32, #tpu.memory_space<vmem>>, vector<64x512xf32>
    tpu.vector_store %arg11[%c0_7, %c0_8], %9 {strides = array<i32>} : memref<64x512xf32, #tpu.memory_space<vmem>>, vector<64x512xf32>,
    %c0_9 = arith.constant 0 : index
    %c0_10 = arith.constant 0 : index
    %11 = vector.load %arg9[%c0_9, %c0_10] : memref<8x128xf32, #tpu.memory_space<vmem>>, vector<8x128xf32>
    %c0_11 = arith.constant 0 : index
    %c0_12 = arith.constant 0 : index
    %12 = vector.load %arg10[%c0_11, %c0_12] : memref<8x128xf32, #tpu.memory_space<vmem>>, vector<8x128xf32>
    %c0_i32_13 = arith.constant 0 : i32
    %c8_i32 = arith.constant 8 : i32
    %13 = arith.muli %c0_i32_13, %c8_i32 : i32
    %14 = tpu.assume_multiple %13, 8 : i32
    %15 = arith.index_cast %14 : i32 to index
    %c0_14 = arith.constant 0 : index
    %16 = vector.load %arg11[%15, %c0_14] : memref<64x512xf32, #tpu.memory_space<vmem>>, vector<8x512xf32>
    %c0_15 = arith.constant 0 : index
    %c0_16 = arith.constant 0 : index
    %17 = vector.load %arg4[%c0_15, %c0_16] : memref<128x512xf32, #tpu.memory_space<vmem>>, vector<128x512xf32>
    %cst_17 = arith.constant dense<0.000000e+00> : vector<8x512xf32>
    %18 = tpu.matmul %11, %17, %cst_17 {dimension_numbers = #tpu.dot_dimension_numbers<[1], [0], [0], [1], [0, 0, 1, 1], [], []>} : vector<8x128xf32>, vector<128x512xf32>, vector<8x512xf32> -> vector<8x512xf32>
    %19 = arith.addf %16, %18 : vector<8x512xf32>
    %20 = vector.extract_strided_slice %19 {offsets = [0, 0], sizes = [8, 128], strides = [1, 1]} : vector<8x512xf32> to vector<8x128xf32>
    %cst_18 = arith.constant 5.000000e-01 : f32
    %21 = vector.broadcast %cst_18 : f32 to vector<8x128xf32>
    %22 = arith.mulf %21, %20 : vector<8x128xf32>
    %23 = math.tanh %22 : vector<8x128xf32>
    %cst_19 = arith.constant 1.000000e+00 : f32
    %24 = vector.broadcast %cst_19 : f32 to vector<8x128xf32>
    %25 = arith.addf %23, %24 : vector<8x128xf32>
    %cst_20 = arith.constant 5.000000e-01 : f32
    %26 = vector.broadcast %cst_20 : f32 to vector<8x128xf32>
    %27 = arith.mulf %26, %25 : vector<8x128xf32>
    %28 = vector.extract_strided_slice %19 {offsets = [0, 128], sizes = [8, 128], strides = [1, 1]} : vector<8x512xf32> to vector<8x128xf32>
    %cst_21 = arith.constant 5.000000e-01 : f32
    %29 = vector.broadcast %cst_21 : f32 to vector<8x128xf32>
    %30 = arith.mulf %29, %28 : vector<8x128xf32>
    %31 = math.tanh %30 : vector<8x128xf32>
    %cst_22 = arith.constant 1.000000e+00 : f32
    %32 = vector.broadcast %cst_22 : f32 to vector<8x128xf32>
    %33 = arith.addf %31, %32 : vector<8x128xf32>
    %cst_23 = arith.constant 5.000000e-01 : f32
    %34 = vector.broadcast %cst_23 : f32 to vector<8x128xf32>
    %35 = arith.mulf %34, %33 : vector<8x128xf32>
    %36 = vector.extract_strided_slice %19 {offsets = [0, 256], sizes = [8, 128], strides = [1, 1]} : vector<8x512xf32> to vector<8x128xf32>
    %37 = math.tanh %36 : vector<8x128xf32>
    %38 = arith.mulf %35, %12 : vector<8x128xf32>
    %39 = arith.mulf %27, %37 : vector<8x128xf32>
    %40 = arith.addf %38, %39 : vector<8x128xf32>
    %41 = vector.extract_strided_slice %19 {offsets = [0, 384], sizes = [8, 128], strides = [1, 1]} : vector<8x512xf32> to vector<8x128xf32>
    %cst_24 = arith.constant 5.000000e-01 : f32
    %42 = vector.broadcast %cst_24 : f32 to vector<8x128xf32>
    %43 = arith.mulf %42, %41 : vector<8x128xf32>
    %44 = math.tanh %43 : vector<8x128xf32>
    %cst_25 = arith.constant 1.000000e+00 : f32
    %45 = vector.broadcast %cst_25 : f32 to vector<8x128xf32>
    %46 = arith.addf %44, %45 : vector<8x128xf32>
    %cst_26 = arith.constant 5.000000e-01 : f32
    %47 = vector.broadcast %cst_26 : f32 to vector<8x128xf32>
    %48 = arith.mulf %47, %46 : vector<8x128xf32>
    %49 = math.tanh %40 : vector<8x128xf32>
    %50 = arith.mulf %48, %49 : vector<8x128xf32>
    %51 = arith.index_cast %c0_i32_13 : i32 to index
    %c0_27 = arith.constant 0 : index
    %c0_28 = arith.constant 0 : index
    %52 = vector.load %arg6[%51, %c0_27, %c0_28] : memref<8x8x128xf32, #tpu.memory_space<vmem>>, vector<1x8x128xf32>
    %53 = vector.shape_cast %52 : vector<1x8x128xf32> to vector<8x128xf32>
    %54 = vector.shape_cast %50 : vector<8x128xf32> to vector<1x8x128xf32>
    tpu.vector_store %arg6[%51, %c0_27, %c0_28], %54 {strides = array<i32>} : memref<8x8x128xf32, #tpu.memory_space<vmem>>, vector<1x8x128xf32>,
    %c1_i32 = arith.constant 1 : i32
    %c8_i32_29 = arith.constant 8 : i32
    %55 = arith.muli %c1_i32, %c8_i32_29 : i32
    %56 = tpu.assume_multiple %55, 8 : i32
    %57 = arith.index_cast %56 : i32 to index
    %c0_30 = arith.constant 0 : index
    %58 = vector.load %arg11[%57, %c0_30] : memref<64x512xf32, #tpu.memory_space<vmem>>, vector<8x512xf32>
    %c0_31 = arith.constant 0 : index
    %c0_32 = arith.constant 0 : index
    %59 = vector.load %arg4[%c0_31, %c0_32] : memref<128x512xf32, #tpu.memory_space<vmem>>, vector<128x512xf32>
    %cst_33 = arith.constant dense<0.000000e+00> : vector<8x512xf32>
    %60 = tpu.matmul %50, %59, %cst_33 {dimension_numbers = #tpu.dot_dimension_numbers<[1], [0], [0], [1], [0, 0, 1, 1], [], []>} : vector<8x128xf32>, vector<128x512xf32>, vector<8x512xf32> -> vector<8x512xf32>
    %61 = arith.addf %58, %60 : vector<8x512xf32>
    %62 = vector.extract_strided_slice %61 {offsets = [0, 0], sizes = [8, 128], strides = [1, 1]} : vector<8x512xf32> to vector<8x128xf32>
    %cst_34 = arith.constant 5.000000e-01 : f32
    %63 = vector.broadcast %cst_34 : f32 to vector<8x128xf32>
    %64 = arith.mulf %63, %62 : vector<8x128xf32>
    %65 = math.tanh %64 : vector<8x128xf32>
    %cst_35 = arith.constant 1.000000e+00 : f32
    %66 = vector.broadcast %cst_35 : f32 to vector<8x128xf32>
    %67 = arith.addf %65, %66 : vector<8x128xf32>
    %cst_36 = arith.constant 5.000000e-01 : f32
    %68 = vector.broadcast %cst_36 : f32 to vector<8x128xf32>
    %69 = arith.mulf %68, %67 : vector<8x128xf32>
    %70 = vector.extract_strided_slice %61 {offsets = [0, 128], sizes = [8, 128], strides = [1, 1]} : vector<8x512xf32> to vector<8x128xf32>
    %cst_37 = arith.constant 5.000000e-01 : f32
    %71 = vector.broadcast %cst_37 : f32 to vector<8x128xf32>
    %72 = arith.mulf %71, %70 : vector<8x128xf32>
    %73 = math.tanh %72 : vector<8x128xf32>
    %cst_38 = arith.constant 1.000000e+00 : f32
    %74 = vector.broadcast %cst_38 : f32 to vector<8x128xf32>
    %75 = arith.addf %73, %74 : vector<8x128xf32>
    %cst_39 = arith.constant 5.000000e-01 : f32
    %76 = vector.broadcast %cst_39 : f32 to vector<8x128xf32>
    %77 = arith.mulf %76, %75 : vector<8x128xf32>
    %78 = vector.extract_strided_slice %61 {offsets = [0, 256], sizes = [8, 128], strides = [1, 1]} : vector<8x512xf32> to vector<8x128xf32>
    %79 = math.tanh %78 : vector<8x128xf32>
    %80 = arith.mulf %77, %40 : vector<8x128xf32>
    %81 = arith.mulf %69, %79 : vector<8x128xf32>
    %82 = arith.addf %80, %81 : vector<8x128xf32>
    %83 = vector.extract_strided_slice %61 {offsets = [0, 384], sizes = [8, 128], strides = [1, 1]} : vector<8x512xf32> to vector<8x128xf32>
    %cst_40 = arith.constant 5.000000e-01 : f32
    %84 = vector.broadcast %cst_40 : f32 to vector<8x128xf32>
    %85 = arith.mulf %84, %83 : vector<8x128xf32>
    %86 = math.tanh %85 : vector<8x128xf32>
    %cst_41 = arith.constant 1.000000e+00 : f32
    %87 = vector.broadcast %cst_41 : f32 to vector<8x128xf32>
    %88 = arith.addf %86, %87 : vector<8x128xf32>
    %cst_42 = arith.constant 5.000000e-01 : f32
    %89 = vector.broadcast %cst_42 : f32 to vector<8x128xf32>
    %90 = arith.mulf %89, %88 : vector<8x128xf32>
    %91 = math.tanh %82 : vector<8x128xf32>
    %92 = arith.mulf %90, %91 : vector<8x128xf32>
    %93 = arith.index_cast %c1_i32 : i32 to index
    %c0_43 = arith.constant 0 : index
    %c0_44 = arith.constant 0 : index
    %94 = vector.load %arg6[%93, %c0_43, %c0_44] : memref<8x8x128xf32, #tpu.memory_space<vmem>>, vector<1x8x128xf32>
    %95 = vector.shape_cast %94 : vector<1x8x128xf32> to vector<8x128xf32>
    %96 = vector.shape_cast %92 : vector<8x128xf32> to vector<1x8x128xf32>
    tpu.vector_store %arg6[%93, %c0_43, %c0_44], %96 {strides = array<i32>} : memref<8x8x128xf32, #tpu.memory_space<vmem>>, vector<1x8x128xf32>,
    %c2_i32 = arith.constant 2 : i32
    %c8_i32_45 = arith.constant 8 : i32
    %97 = arith.muli %c2_i32, %c8_i32_45 : i32
    %98 = tpu.assume_multiple %97, 8 : i32
    %99 = arith.index_cast %98 : i32 to index
    %c0_46 = arith.constant 0 : index
    %100 = vector.load %arg11[%99, %c0_46] : memref<64x512xf32, #tpu.memory_space<vmem>>, vector<8x512xf32>
    %c0_47 = arith.constant 0 : index
    %c0_48 = arith.constant 0 : index
    %101 = vector.load %arg4[%c0_47, %c0_48] : memref<128x512xf32, #tpu.memory_space<vmem>>, vector<128x512xf32>
    %cst_49 = arith.constant dense<0.000000e+00> : vector<8x512xf32>
    %102 = tpu.matmul %92, %101, %cst_49 {dimension_numbers = #tpu.dot_dimension_numbers<[1], [0], [0], [1], [0, 0, 1, 1], [], []>} : vector<8x128xf32>, vector<128x512xf32>, vector<8x512xf32> -> vector<8x512xf32>
    %103 = arith.addf %100, %102 : vector<8x512xf32>
    %104 = vector.extract_strided_slice %103 {offsets = [0, 0], sizes = [8, 128], strides = [1, 1]} : vector<8x512xf32> to vector<8x128xf32>
    %cst_50 = arith.constant 5.000000e-01 : f32
    %105 = vector.broadcast %cst_50 : f32 to vector<8x128xf32>
    %106 = arith.mulf %105, %104 : vector<8x128xf32>
    %107 = math.tanh %106 : vector<8x128xf32>
    %cst_51 = arith.constant 1.000000e+00 : f32
    %108 = vector.broadcast %cst_51 : f32 to vector<8x128xf32>
    %109 = arith.addf %107, %108 : vector<8x128xf32>
    %cst_52 = arith.constant 5.000000e-01 : f32
    %110 = vector.broadcast %cst_52 : f32 to vector<8x128xf32>
    %111 = arith.mulf %110, %109 : vector<8x128xf32>
    %112 = vector.extract_strided_slice %103 {offsets = [0, 128], sizes = [8, 128], strides = [1, 1]} : vector<8x512xf32> to vector<8x128xf32>
    %cst_53 = arith.constant 5.000000e-01 : f32
    %113 = vector.broadcast %cst_53 : f32 to vector<8x128xf32>
    %114 = arith.mulf %113, %112 : vector<8x128xf32>
    %115 = math.tanh %114 : vector<8x128xf32>
    %cst_54 = arith.constant 1.000000e+00 : f32
    %116 = vector.broadcast %cst_54 : f32 to vector<8x128xf32>
    %117 = arith.addf %115, %116 : vector<8x128xf32>
    %cst_55 = arith.constant 5.000000e-01 : f32
    %118 = vector.broadcast %cst_55 : f32 to vector<8x128xf32>
    %119 = arith.mulf %118, %117 : vector<8x128xf32>
    %120 = vector.extract_strided_slice %103 {offsets = [0, 256], sizes = [8, 128], strides = [1, 1]} : vector<8x512xf32> to vector<8x128xf32>
    %121 = math.tanh %120 : vector<8x128xf32>
    %122 = arith.mulf %119, %82 : vector<8x128xf32>
    %123 = arith.mulf %111, %121 : vector<8x128xf32>
    %124 = arith.addf %122, %123 : vector<8x128xf32>
    %125 = vector.extract_strided_slice %103 {offsets = [0, 384], sizes = [8, 128], strides = [1, 1]} : vector<8x512xf32> to vector<8x128xf32>
    %cst_56 = arith.constant 5.000000e-01 : f32
    %126 = vector.broadcast %cst_56 : f32 to vector<8x128xf32>
    %127 = arith.mulf %126, %125 : vector<8x128xf32>
    %128 = math.tanh %127 : vector<8x128xf32>
    %cst_57 = arith.constant 1.000000e+00 : f32
    %129 = vector.broadcast %cst_57 : f32 to vector<8x128xf32>
    %130 = arith.addf %128, %129 : vector<8x128xf32>
    %cst_58 = arith.constant 5.000000e-01 : f32
    %131 = vector.broadcast %cst_58 : f32 to vector<8x128xf32>
    %132 = arith.mulf %131, %130 : vector<8x128xf32>
    %133 = math.tanh %124 : vector<8x128xf32>
    %134 = arith.mulf %132, %133 : vector<8x128xf32>
    %135 = arith.index_cast %c2_i32 : i32 to index
    %c0_59 = arith.constant 0 : index
    %c0_60 = arith.constant 0 : index
    %136 = vector.load %arg6[%135, %c0_59, %c0_60] : memref<8x8x128xf32, #tpu.memory_space<vmem>>, vector<1x8x128xf32>
    %137 = vector.shape_cast %136 : vector<1x8x128xf32> to vector<8x128xf32>
    %138 = vector.shape_cast %134 : vector<8x128xf32> to vector<1x8x128xf32>
    tpu.vector_store %arg6[%135, %c0_59, %c0_60], %138 {strides = array<i32>} : memref<8x8x128xf32, #tpu.memory_space<vmem>>, vector<1x8x128xf32>,
    %c3_i32 = arith.constant 3 : i32
    %c8_i32_61 = arith.constant 8 : i32
    %139 = arith.muli %c3_i32, %c8_i32_61 : i32
    %140 = tpu.assume_multiple %139, 8 : i32
    %141 = arith.index_cast %140 : i32 to index
    %c0_62 = arith.constant 0 : index
    %142 = vector.load %arg11[%141, %c0_62] : memref<64x512xf32, #tpu.memory_space<vmem>>, vector<8x512xf32>
    %c0_63 = arith.constant 0 : index
    %c0_64 = arith.constant 0 : index
    %143 = vector.load %arg4[%c0_63, %c0_64] : memref<128x512xf32, #tpu.memory_space<vmem>>, vector<128x512xf32>
    %cst_65 = arith.constant dense<0.000000e+00> : vector<8x512xf32>
    %144 = tpu.matmul %134, %143, %cst_65 {dimension_numbers = #tpu.dot_dimension_numbers<[1], [0], [0], [1], [0, 0, 1, 1], [], []>} : vector<8x128xf32>, vector<128x512xf32>, vector<8x512xf32> -> vector<8x512xf32>
    %145 = arith.addf %142, %144 : vector<8x512xf32>
    %146 = vector.extract_strided_slice %145 {offsets = [0, 0], sizes = [8, 128], strides = [1, 1]} : vector<8x512xf32> to vector<8x128xf32>
    %cst_66 = arith.constant 5.000000e-01 : f32
    %147 = vector.broadcast %cst_66 : f32 to vector<8x128xf32>
    %148 = arith.mulf %147, %146 : vector<8x128xf32>
    %149 = math.tanh %148 : vector<8x128xf32>
    %cst_67 = arith.constant 1.000000e+00 : f32
    %150 = vector.broadcast %cst_67 : f32 to vector<8x128xf32>
    %151 = arith.addf %149, %150 : vector<8x128xf32>
    %cst_68 = arith.constant 5.000000e-01 : f32
    %152 = vector.broadcast %cst_68 : f32 to vector<8x128xf32>
    %153 = arith.mulf %152, %151 : vector<8x128xf32>
    %154 = vector.extract_strided_slice %145 {offsets = [0, 128], sizes = [8, 128], strides = [1, 1]} : vector<8x512xf32> to vector<8x128xf32>
    %cst_69 = arith.constant 5.000000e-01 : f32
    %155 = vector.broadcast %cst_69 : f32 to vector<8x128xf32>
    %156 = arith.mulf %155, %154 : vector<8x128xf32>
    %157 = math.tanh %156 : vector<8x128xf32>
    %cst_70 = arith.constant 1.000000e+00 : f32
    %158 = vector.broadcast %cst_70 : f32 to vector<8x128xf32>
    %159 = arith.addf %157, %158 : vector<8x128xf32>
    %cst_71 = arith.constant 5.000000e-01 : f32
    %160 = vector.broadcast %cst_71 : f32 to vector<8x128xf32>
    %161 = arith.mulf %160, %159 : vector<8x128xf32>
    %162 = vector.extract_strided_slice %145 {offsets = [0, 256], sizes = [8, 128], strides = [1, 1]} : vector<8x512xf32> to vector<8x128xf32>
    %163 = math.tanh %162 : vector<8x128xf32>
    %164 = arith.mulf %161, %124 : vector<8x128xf32>
    %165 = arith.mulf %153, %163 : vector<8x128xf32>
    %166 = arith.addf %164, %165 : vector<8x128xf32>
    %167 = vector.extract_strided_slice %145 {offsets = [0, 384], sizes = [8, 128], strides = [1, 1]} : vector<8x512xf32> to vector<8x128xf32>
    %cst_72 = arith.constant 5.000000e-01 : f32
    %168 = vector.broadcast %cst_72 : f32 to vector<8x128xf32>
    %169 = arith.mulf %168, %167 : vector<8x128xf32>
    %170 = math.tanh %169 : vector<8x128xf32>
    %cst_73 = arith.constant 1.000000e+00 : f32
    %171 = vector.broadcast %cst_73 : f32 to vector<8x128xf32>
    %172 = arith.addf %170, %171 : vector<8x128xf32>
    %cst_74 = arith.constant 5.000000e-01 : f32
    %173 = vector.broadcast %cst_74 : f32 to vector<8x128xf32>
    %174 = arith.mulf %173, %172 : vector<8x128xf32>
    %175 = math.tanh %166 : vector<8x128xf32>
    %176 = arith.mulf %174, %175 : vector<8x128xf32>
    %177 = arith.index_cast %c3_i32 : i32 to index
    %c0_75 = arith.constant 0 : index
    %c0_76 = arith.constant 0 : index
    %178 = vector.load %arg6[%177, %c0_75, %c0_76] : memref<8x8x128xf32, #tpu.memory_space<vmem>>, vector<1x8x128xf32>
    %179 = vector.shape_cast %178 : vector<1x8x128xf32> to vector<8x128xf32>
    %180 = vector.shape_cast %176 : vector<8x128xf32> to vector<1x8x128xf32>
    tpu.vector_store %arg6[%177, %c0_75, %c0_76], %180 {strides = array<i32>} : memref<8x8x128xf32, #tpu.memory_space<vmem>>, vector<1x8x128xf32>,
    %c4_i32 = arith.constant 4 : i32
    %c8_i32_77 = arith.constant 8 : i32
    %181 = arith.muli %c4_i32, %c8_i32_77 : i32
    %182 = tpu.assume_multiple %181, 8 : i32
    %183 = arith.index_cast %182 : i32 to index
    %c0_78 = arith.constant 0 : index
    %184 = vector.load %arg11[%183, %c0_78] : memref<64x512xf32, #tpu.memory_space<vmem>>, vector<8x512xf32>
    %c0_79 = arith.constant 0 : index
    %c0_80 = arith.constant 0 : index
    %185 = vector.load %arg4[%c0_79, %c0_80] : memref<128x512xf32, #tpu.memory_space<vmem>>, vector<128x512xf32>
    %cst_81 = arith.constant dense<0.000000e+00> : vector<8x512xf32>
    %186 = tpu.matmul %176, %185, %cst_81 {dimension_numbers = #tpu.dot_dimension_numbers<[1], [0], [0], [1], [0, 0, 1, 1], [], []>} : vector<8x128xf32>, vector<128x512xf32>, vector<8x512xf32> -> vector<8x512xf32>
    %187 = arith.addf %184, %186 : vector<8x512xf32>
    %188 = vector.extract_strided_slice %187 {offsets = [0, 0], sizes = [8, 128], strides = [1, 1]} : vector<8x512xf32> to vector<8x128xf32>
    %cst_82 = arith.constant 5.000000e-01 : f32
    %189 = vector.broadcast %cst_82 : f32 to vector<8x128xf32>
    %190 = arith.mulf %189, %188 : vector<8x128xf32>
    %191 = math.tanh %190 : vector<8x128xf32>
    %cst_83 = arith.constant 1.000000e+00 : f32
    %192 = vector.broadcast %cst_83 : f32 to vector<8x128xf32>
    %193 = arith.addf %191, %192 : vector<8x128xf32>
    %cst_84 = arith.constant 5.000000e-01 : f32
    %194 = vector.broadcast %cst_84 : f32 to vector<8x128xf32>
    %195 = arith.mulf %194, %193 : vector<8x128xf32>
    %196 = vector.extract_strided_slice %187 {offsets = [0, 128], sizes = [8, 128], strides = [1, 1]} : vector<8x512xf32> to vector<8x128xf32>
    %cst_85 = arith.constant 5.000000e-01 : f32
    %197 = vector.broadcast %cst_85 : f32 to vector<8x128xf32>
    %198 = arith.mulf %197, %196 : vector<8x128xf32>
    %199 = math.tanh %198 : vector<8x128xf32>
    %cst_86 = arith.constant 1.000000e+00 : f32
    %200 = vector.broadcast %cst_86 : f32 to vector<8x128xf32>
    %201 = arith.addf %199, %200 : vector<8x128xf32>
    %cst_87 = arith.constant 5.000000e-01 : f32
    %202 = vector.broadcast %cst_87 : f32 to vector<8x128xf32>
    %203 = arith.mulf %202, %201 : vector<8x128xf32>
    %204 = vector.extract_strided_slice %187 {offsets = [0, 256], sizes = [8, 128], strides = [1, 1]} : vector<8x512xf32> to vector<8x128xf32>
    %205 = math.tanh %204 : vector<8x128xf32>
    %206 = arith.mulf %203, %166 : vector<8x128xf32>
    %207 = arith.mulf %195, %205 : vector<8x128xf32>
    %208 = arith.addf %206, %207 : vector<8x128xf32>
    %209 = vector.extract_strided_slice %187 {offsets = [0, 384], sizes = [8, 128], strides = [1, 1]} : vector<8x512xf32> to vector<8x128xf32>
    %cst_88 = arith.constant 5.000000e-01 : f32
    %210 = vector.broadcast %cst_88 : f32 to vector<8x128xf32>
    %211 = arith.mulf %210, %209 : vector<8x128xf32>
    %212 = math.tanh %211 : vector<8x128xf32>
    %cst_89 = arith.constant 1.000000e+00 : f32
    %213 = vector.broadcast %cst_89 : f32 to vector<8x128xf32>
    %214 = arith.addf %212, %213 : vector<8x128xf32>
    %cst_90 = arith.constant 5.000000e-01 : f32
    %215 = vector.broadcast %cst_90 : f32 to vector<8x128xf32>
    %216 = arith.mulf %215, %214 : vector<8x128xf32>
    %217 = math.tanh %208 : vector<8x128xf32>
    %218 = arith.mulf %216, %217 : vector<8x128xf32>
    %219 = arith.index_cast %c4_i32 : i32 to index
    %c0_91 = arith.constant 0 : index
    %c0_92 = arith.constant 0 : index
    %220 = vector.load %arg6[%219, %c0_91, %c0_92] : memref<8x8x128xf32, #tpu.memory_space<vmem>>, vector<1x8x128xf32>
    %221 = vector.shape_cast %220 : vector<1x8x128xf32> to vector<8x128xf32>
    %222 = vector.shape_cast %218 : vector<8x128xf32> to vector<1x8x128xf32>
    tpu.vector_store %arg6[%219, %c0_91, %c0_92], %222 {strides = array<i32>} : memref<8x8x128xf32, #tpu.memory_space<vmem>>, vector<1x8x128xf32>,
    %c5_i32 = arith.constant 5 : i32
    %c8_i32_93 = arith.constant 8 : i32
    %223 = arith.muli %c5_i32, %c8_i32_93 : i32
    %224 = tpu.assume_multiple %223, 8 : i32
    %225 = arith.index_cast %224 : i32 to index
    %c0_94 = arith.constant 0 : index
    %226 = vector.load %arg11[%225, %c0_94] : memref<64x512xf32, #tpu.memory_space<vmem>>, vector<8x512xf32>
    %c0_95 = arith.constant 0 : index
    %c0_96 = arith.constant 0 : index
    %227 = vector.load %arg4[%c0_95, %c0_96] : memref<128x512xf32, #tpu.memory_space<vmem>>, vector<128x512xf32>
    %cst_97 = arith.constant dense<0.000000e+00> : vector<8x512xf32>
    %228 = tpu.matmul %218, %227, %cst_97 {dimension_numbers = #tpu.dot_dimension_numbers<[1], [0], [0], [1], [0, 0, 1, 1], [], []>} : vector<8x128xf32>, vector<128x512xf32>, vector<8x512xf32> -> vector<8x512xf32>
    %229 = arith.addf %226, %228 : vector<8x512xf32>
    %230 = vector.extract_strided_slice %229 {offsets = [0, 0], sizes = [8, 128], strides = [1, 1]} : vector<8x512xf32> to vector<8x128xf32>
    %cst_98 = arith.constant 5.000000e-01 : f32
    %231 = vector.broadcast %cst_98 : f32 to vector<8x128xf32>
    %232 = arith.mulf %231, %230 : vector<8x128xf32>
    %233 = math.tanh %232 : vector<8x128xf32>
    %cst_99 = arith.constant 1.000000e+00 : f32
    %234 = vector.broadcast %cst_99 : f32 to vector<8x128xf32>
    %235 = arith.addf %233, %234 : vector<8x128xf32>
    %cst_100 = arith.constant 5.000000e-01 : f32
    %236 = vector.broadcast %cst_100 : f32 to vector<8x128xf32>
    %237 = arith.mulf %236, %235 : vector<8x128xf32>
    %238 = vector.extract_strided_slice %229 {offsets = [0, 128], sizes = [8, 128], strides = [1, 1]} : vector<8x512xf32> to vector<8x128xf32>
    %cst_101 = arith.constant 5.000000e-01 : f32
    %239 = vector.broadcast %cst_101 : f32 to vector<8x128xf32>
    %240 = arith.mulf %239, %238 : vector<8x128xf32>
    %241 = math.tanh %240 : vector<8x128xf32>
    %cst_102 = arith.constant 1.000000e+00 : f32
    %242 = vector.broadcast %cst_102 : f32 to vector<8x128xf32>
    %243 = arith.addf %241, %242 : vector<8x128xf32>
    %cst_103 = arith.constant 5.000000e-01 : f32
    %244 = vector.broadcast %cst_103 : f32 to vector<8x128xf32>
    %245 = arith.mulf %244, %243 : vector<8x128xf32>
    %246 = vector.extract_strided_slice %229 {offsets = [0, 256], sizes = [8, 128], strides = [1, 1]} : vector<8x512xf32> to vector<8x128xf32>
    %247 = math.tanh %246 : vector<8x128xf32>
    %248 = arith.mulf %245, %208 : vector<8x128xf32>
    %249 = arith.mulf %237, %247 : vector<8x128xf32>
    %250 = arith.addf %248, %249 : vector<8x128xf32>
    %251 = vector.extract_strided_slice %229 {offsets = [0, 384], sizes = [8, 128], strides = [1, 1]} : vector<8x512xf32> to vector<8x128xf32>
    %cst_104 = arith.constant 5.000000e-01 : f32
    %252 = vector.broadcast %cst_104 : f32 to vector<8x128xf32>
    %253 = arith.mulf %252, %251 : vector<8x128xf32>
    %254 = math.tanh %253 : vector<8x128xf32>
    %cst_105 = arith.constant 1.000000e+00 : f32
    %255 = vector.broadcast %cst_105 : f32 to vector<8x128xf32>
    %256 = arith.addf %254, %255 : vector<8x128xf32>
    %cst_106 = arith.constant 5.000000e-01 : f32
    %257 = vector.broadcast %cst_106 : f32 to vector<8x128xf32>
    %258 = arith.mulf %257, %256 : vector<8x128xf32>
    %259 = math.tanh %250 : vector<8x128xf32>
    %260 = arith.mulf %258, %259 : vector<8x128xf32>
    %261 = arith.index_cast %c5_i32 : i32 to index
    %c0_107 = arith.constant 0 : index
    %c0_108 = arith.constant 0 : index
    %262 = vector.load %arg6[%261, %c0_107, %c0_108] : memref<8x8x128xf32, #tpu.memory_space<vmem>>, vector<1x8x128xf32>
    %263 = vector.shape_cast %262 : vector<1x8x128xf32> to vector<8x128xf32>
    %264 = vector.shape_cast %260 : vector<8x128xf32> to vector<1x8x128xf32>
    tpu.vector_store %arg6[%261, %c0_107, %c0_108], %264 {strides = array<i32>} : memref<8x8x128xf32, #tpu.memory_space<vmem>>, vector<1x8x128xf32>,
    %c6_i32 = arith.constant 6 : i32
    %c8_i32_109 = arith.constant 8 : i32
    %265 = arith.muli %c6_i32, %c8_i32_109 : i32
    %266 = tpu.assume_multiple %265, 8 : i32
    %267 = arith.index_cast %266 : i32 to index
    %c0_110 = arith.constant 0 : index
    %268 = vector.load %arg11[%267, %c0_110] : memref<64x512xf32, #tpu.memory_space<vmem>>, vector<8x512xf32>
    %c0_111 = arith.constant 0 : index
    %c0_112 = arith.constant 0 : index
    %269 = vector.load %arg4[%c0_111, %c0_112] : memref<128x512xf32, #tpu.memory_space<vmem>>, vector<128x512xf32>
    %cst_113 = arith.constant dense<0.000000e+00> : vector<8x512xf32>
    %270 = tpu.matmul %260, %269, %cst_113 {dimension_numbers = #tpu.dot_dimension_numbers<[1], [0], [0], [1], [0, 0, 1, 1], [], []>} : vector<8x128xf32>, vector<128x512xf32>, vector<8x512xf32> -> vector<8x512xf32>
    %271 = arith.addf %268, %270 : vector<8x512xf32>
    %272 = vector.extract_strided_slice %271 {offsets = [0, 0], sizes = [8, 128], strides = [1, 1]} : vector<8x512xf32> to vector<8x128xf32>
    %cst_114 = arith.constant 5.000000e-01 : f32
    %273 = vector.broadcast %cst_114 : f32 to vector<8x128xf32>
    %274 = arith.mulf %273, %272 : vector<8x128xf32>
    %275 = math.tanh %274 : vector<8x128xf32>
    %cst_115 = arith.constant 1.000000e+00 : f32
    %276 = vector.broadcast %cst_115 : f32 to vector<8x128xf32>
    %277 = arith.addf %275, %276 : vector<8x128xf32>
    %cst_116 = arith.constant 5.000000e-01 : f32
    %278 = vector.broadcast %cst_116 : f32 to vector<8x128xf32>
    %279 = arith.mulf %278, %277 : vector<8x128xf32>
    %280 = vector.extract_strided_slice %271 {offsets = [0, 128], sizes = [8, 128], strides = [1, 1]} : vector<8x512xf32> to vector<8x128xf32>
    %cst_117 = arith.constant 5.000000e-01 : f32
    %281 = vector.broadcast %cst_117 : f32 to vector<8x128xf32>
    %282 = arith.mulf %281, %280 : vector<8x128xf32>
    %283 = math.tanh %282 : vector<8x128xf32>
    %cst_118 = arith.constant 1.000000e+00 : f32
    %284 = vector.broadcast %cst_118 : f32 to vector<8x128xf32>
    %285 = arith.addf %283, %284 : vector<8x128xf32>
    %cst_119 = arith.constant 5.000000e-01 : f32
    %286 = vector.broadcast %cst_119 : f32 to vector<8x128xf32>
    %287 = arith.mulf %286, %285 : vector<8x128xf32>
    %288 = vector.extract_strided_slice %271 {offsets = [0, 256], sizes = [8, 128], strides = [1, 1]} : vector<8x512xf32> to vector<8x128xf32>
    %289 = math.tanh %288 : vector<8x128xf32>
    %290 = arith.mulf %287, %250 : vector<8x128xf32>
    %291 = arith.mulf %279, %289 : vector<8x128xf32>
    %292 = arith.addf %290, %291 : vector<8x128xf32>
    %293 = vector.extract_strided_slice %271 {offsets = [0, 384], sizes = [8, 128], strides = [1, 1]} : vector<8x512xf32> to vector<8x128xf32>
    %cst_120 = arith.constant 5.000000e-01 : f32
    %294 = vector.broadcast %cst_120 : f32 to vector<8x128xf32>
    %295 = arith.mulf %294, %293 : vector<8x128xf32>
    %296 = math.tanh %295 : vector<8x128xf32>
    %cst_121 = arith.constant 1.000000e+00 : f32
    %297 = vector.broadcast %cst_121 : f32 to vector<8x128xf32>
    %298 = arith.addf %296, %297 : vector<8x128xf32>
    %cst_122 = arith.constant 5.000000e-01 : f32
    %299 = vector.broadcast %cst_122 : f32 to vector<8x128xf32>
    %300 = arith.mulf %299, %298 : vector<8x128xf32>
    %301 = math.tanh %292 : vector<8x128xf32>
    %302 = arith.mulf %300, %301 : vector<8x128xf32>
    %303 = arith.index_cast %c6_i32 : i32 to index
    %c0_123 = arith.constant 0 : index
    %c0_124 = arith.constant 0 : index
    %304 = vector.load %arg6[%303, %c0_123, %c0_124] : memref<8x8x128xf32, #tpu.memory_space<vmem>>, vector<1x8x128xf32>
    %305 = vector.shape_cast %304 : vector<1x8x128xf32> to vector<8x128xf32>
    %306 = vector.shape_cast %302 : vector<8x128xf32> to vector<1x8x128xf32>
    tpu.vector_store %arg6[%303, %c0_123, %c0_124], %306 {strides = array<i32>} : memref<8x8x128xf32, #tpu.memory_space<vmem>>, vector<1x8x128xf32>,
    %c7_i32 = arith.constant 7 : i32
    %c8_i32_125 = arith.constant 8 : i32
    %307 = arith.muli %c7_i32, %c8_i32_125 : i32
    %308 = tpu.assume_multiple %307, 8 : i32
    %309 = arith.index_cast %308 : i32 to index
    %c0_126 = arith.constant 0 : index
    %310 = vector.load %arg11[%309, %c0_126] : memref<64x512xf32, #tpu.memory_space<vmem>>, vector<8x512xf32>
    %c0_127 = arith.constant 0 : index
    %c0_128 = arith.constant 0 : index
    %311 = vector.load %arg4[%c0_127, %c0_128] : memref<128x512xf32, #tpu.memory_space<vmem>>, vector<128x512xf32>
    %cst_129 = arith.constant dense<0.000000e+00> : vector<8x512xf32>
    %312 = tpu.matmul %302, %311, %cst_129 {dimension_numbers = #tpu.dot_dimension_numbers<[1], [0], [0], [1], [0, 0, 1, 1], [], []>} : vector<8x128xf32>, vector<128x512xf32>, vector<8x512xf32> -> vector<8x512xf32>
    %313 = arith.addf %310, %312 : vector<8x512xf32>
    %314 = vector.extract_strided_slice %313 {offsets = [0, 0], sizes = [8, 128], strides = [1, 1]} : vector<8x512xf32> to vector<8x128xf32>
    %cst_130 = arith.constant 5.000000e-01 : f32
    %315 = vector.broadcast %cst_130 : f32 to vector<8x128xf32>
    %316 = arith.mulf %315, %314 : vector<8x128xf32>
    %317 = math.tanh %316 : vector<8x128xf32>
    %cst_131 = arith.constant 1.000000e+00 : f32
    %318 = vector.broadcast %cst_131 : f32 to vector<8x128xf32>
    %319 = arith.addf %317, %318 : vector<8x128xf32>
    %cst_132 = arith.constant 5.000000e-01 : f32
    %320 = vector.broadcast %cst_132 : f32 to vector<8x128xf32>
    %321 = arith.mulf %320, %319 : vector<8x128xf32>
    %322 = vector.extract_strided_slice %313 {offsets = [0, 128], sizes = [8, 128], strides = [1, 1]} : vector<8x512xf32> to vector<8x128xf32>
    %cst_133 = arith.constant 5.000000e-01 : f32
    %323 = vector.broadcast %cst_133 : f32 to vector<8x128xf32>
    %324 = arith.mulf %323, %322 : vector<8x128xf32>
    %325 = math.tanh %324 : vector<8x128xf32>
    %cst_134 = arith.constant 1.000000e+00 : f32
    %326 = vector.broadcast %cst_134 : f32 to vector<8x128xf32>
    %327 = arith.addf %325, %326 : vector<8x128xf32>
    %cst_135 = arith.constant 5.000000e-01 : f32
    %328 = vector.broadcast %cst_135 : f32 to vector<8x128xf32>
    %329 = arith.mulf %328, %327 : vector<8x128xf32>
    %330 = vector.extract_strided_slice %313 {offsets = [0, 256], sizes = [8, 128], strides = [1, 1]} : vector<8x512xf32> to vector<8x128xf32>
    %331 = math.tanh %330 : vector<8x128xf32>
    %332 = arith.mulf %329, %292 : vector<8x128xf32>
    %333 = arith.mulf %321, %331 : vector<8x128xf32>
    %334 = arith.addf %332, %333 : vector<8x128xf32>
    %335 = vector.extract_strided_slice %313 {offsets = [0, 384], sizes = [8, 128], strides = [1, 1]} : vector<8x512xf32> to vector<8x128xf32>
    %cst_136 = arith.constant 5.000000e-01 : f32
    %336 = vector.broadcast %cst_136 : f32 to vector<8x128xf32>
    %337 = arith.mulf %336, %335 : vector<8x128xf32>
    %338 = math.tanh %337 : vector<8x128xf32>
    %cst_137 = arith.constant 1.000000e+00 : f32
    %339 = vector.broadcast %cst_137 : f32 to vector<8x128xf32>
    %340 = arith.addf %338, %339 : vector<8x128xf32>
    %cst_138 = arith.constant 5.000000e-01 : f32
    %341 = vector.broadcast %cst_138 : f32 to vector<8x128xf32>
    %342 = arith.mulf %341, %340 : vector<8x128xf32>
    %343 = math.tanh %334 : vector<8x128xf32>
    %344 = arith.mulf %342, %343 : vector<8x128xf32>
    %345 = arith.index_cast %c7_i32 : i32 to index
    %c0_139 = arith.constant 0 : index
    %c0_140 = arith.constant 0 : index
    %346 = vector.load %arg6[%345, %c0_139, %c0_140] : memref<8x8x128xf32, #tpu.memory_space<vmem>>, vector<1x8x128xf32>
    %347 = vector.shape_cast %346 : vector<1x8x128xf32> to vector<8x128xf32>
    %348 = vector.shape_cast %344 : vector<8x128xf32> to vector<1x8x128xf32>
    tpu.vector_store %arg6[%345, %c0_139, %c0_140], %348 {strides = array<i32>} : memref<8x8x128xf32, #tpu.memory_space<vmem>>, vector<1x8x128xf32>,
    %c8_i32_141 = arith.constant 8 : i32
    %c0_142 = arith.constant 0 : index
    %c0_143 = arith.constant 0 : index
    %349 = vector.load %arg9[%c0_142, %c0_143] : memref<8x128xf32, #tpu.memory_space<vmem>>, vector<8x128xf32>
    tpu.vector_store %arg9[%c0_142, %c0_143], %344 {strides = array<i32>} : memref<8x128xf32, #tpu.memory_space<vmem>>, vector<8x128xf32>,
    %c0_144 = arith.constant 0 : index
    %c0_145 = arith.constant 0 : index
    %350 = vector.load %arg10[%c0_144, %c0_145] : memref<8x128xf32, #tpu.memory_space<vmem>>, vector<8x128xf32>
    tpu.vector_store %arg10[%c0_144, %c0_145], %334 {strides = array<i32>} : memref<8x128xf32, #tpu.memory_space<vmem>>, vector<8x128xf32>,
    %c0_i32_146 = arith.constant 0 : i32
    %351 = arith.cmpi eq, %arg1, %c0_i32_146 : i32
    %352 = arith.extui %351 : i1 to i32
    %c0_i32_147 = arith.constant 0 : i32
    %353 = arith.cmpi ne, %352, %c0_i32_147 : i32
    scf.if %353 {
      %c0_148 = arith.constant 0 : index
      %c0_149 = arith.constant 0 : index
      %354 = vector.load %arg7[%c0_148, %c0_149] : memref<8x128xf32, #tpu.memory_space<vmem>>, vector<8x128xf32>
      tpu.vector_store %arg7[%c0_148, %c0_149], %344 {strides = array<i32>} : memref<8x128xf32, #tpu.memory_space<vmem>>, vector<8x128xf32>,
      %c0_150 = arith.constant 0 : index
      %c0_151 = arith.constant 0 : index
      %355 = vector.load %arg8[%c0_150, %c0_151] : memref<8x128xf32, #tpu.memory_space<vmem>>, vector<8x128xf32>
      tpu.vector_store %arg8[%c0_150, %c0_151], %334 {strides = array<i32>} : memref<8x128xf32, #tpu.memory_space<vmem>>, vector<8x128xf32>,
    } else {
    }
    return
  }
  func.func @transform_0(%arg0: i32, %arg1: i32) -> (i32, i32, i32) {
    %c0_i32 = arith.constant 0 : i32
    %c0_i32_0 = arith.constant 0 : i32
    return %arg1, %arg0, %c0_i32 : i32, i32, i32
  }
  func.func @transform_1(%arg0: i32, %arg1: i32) -> (i32, i32) {
    %c0_i32 = arith.constant 0 : i32
    %c0_i32_0 = arith.constant 0 : i32
    %c0_i32_1 = arith.constant 0 : i32
    return %c0_i32, %c0_i32_0 : i32, i32
  }
  func.func @transform_2(%arg0: i32, %arg1: i32) -> (i32, i32) {
    %c0_i32 = arith.constant 0 : i32
    %c0_i32_0 = arith.constant 0 : i32
    %c0_i32_1 = arith.constant 0 : i32
    return %c0_i32, %c0_i32_0 : i32, i32
  }
  func.func @transform_3(%arg0: i32, %arg1: i32) -> (i32, i32) {
    %c0_i32 = arith.constant 0 : i32
    %c0_i32_0 = arith.constant 0 : i32
    %c0_i32_1 = arith.constant 0 : i32
    return %c0_i32, %c0_i32_0 : i32, i32
  }
  func.func @transform_4(%arg0: i32, %arg1: i32) -> (i32, i32, i32) {
    %c0_i32 = arith.constant 0 : i32
    %c0_i32_0 = arith.constant 0 : i32
    return %arg1, %arg0, %c0_i32 : i32, i32, i32
  }
  func.func @transform_5(%arg0: i32, %arg1: i32) -> (i32, i32) {
    %c0_i32 = arith.constant 0 : i32
    %c0_i32_0 = arith.constant 0 : i32
    return %arg0, %c0_i32 : i32, i32
  }
  func.func @transform_6(%arg0: i32, %arg1: i32) -> (i32, i32) {
    %c0_i32 = arith.constant 0 : i32
    %c0_i32_0 = arith.constant 0 : i32
    return %arg0, %c0_i32 : i32, i32
  }
}

</mosaic_0001>

<bundles_post_ra>
// kernel: tpu_custom_call.1
= control target key start
LH: loop header
LB: loop body
LE: loop exit
PB: predicated region body
PF: predicated region fallthrough
CT: control target
= control target key end

     0   :  { %12 = vsyncpa [#allocation6], 0  ;;  %s3858_s0 = inlined_call_operand.hbm [shape: f32[8,8,16], index: 0, kind: input, shape index: {}]   ;;  %s3859_s1 = inlined_call_operand.hbm [shape: f32[16,512], index: 1, kind: input, shape index: {}]   ;;  %s3860_s2 = inlined_call_operand.hbm [shape: f32[128,512], index: 2, kind: input, shape index: {}]   ;;  %s3861_s3 = inlined_call_operand.hbm [shape: f32[1,512], index: 3, kind: input, shape index: {}]   ;;  %s3862_s4 = inlined_call_operand.hbm [shape: f32[8,8,128], index: 4, kind: output, shape index: {0}]   ;;  %s3863_s5 = inlined_call_operand.hbm [shape: f32[8,128], index: 5, kind: output, shape index: {1}]   ;;  %s3864_s6 = inlined_call_operand.hbm [shape: f32[8,128], index: 6, kind: output, shape index: {2}]  }
   0x1   :  { %13 = vsyncpa [#allocation9], 0 }
   0x2   :  { %14 = vsyncpa [#allocation12], 0 }
   0x3   :  { %15 = vsyncpa [#allocation7], 0 }
   0x4   :  { %16 = vsyncpa [#allocation15], 0  ;;  %s3215_s21 = smov [#allocation8]   ;;  %s3051_s25 = scalar_lea.hbm %s3859_s1, 1024 }
   0x5   :  { %s34_s22 = sshll.u32 %s3215_s21, 4  ;;  %p3052_p0 = scmp.ne.s32.totalorder %s3859_s1, %s3051_s25  ;;  %s35_s22 = int_to_ptr.vmem [resolvable:$true] %s34_s22 }
   0x6   :  { %p3055_p1 = scmp.lt.u32.totalorder %s3051_s25, %s3859_s1 }
   0x8   :  { %p3057_p2 = pnand %p3055_p1, %p3052_p0 }
   0xa   :  { %3060 = shalt.err (!%p3057_p2)
}
   0xb   :  { %s3061_s30 = scalar_lea.vmem %s35_s22, 1024  ;;  %p3066_p4 = scmp.lt.s32.totalorder %s35_s22, %s35_s22 }
   0xc   :  { %p3062_p3 = scmp.ne.s32.totalorder %s35_s22, %s3061_s30  ;;  %p3067_p5 = scmp.lt.s32.totalorder %s3061_s30, %s3061_s30 }
   0xe   :  { %p3068_p6 = por %p3067_p5, %p3066_p4 }
  0x10   :  { %p3069_p7 = pnand %p3068_p6, %p3062_p3 }
  0x12   :  { %3072 = shalt.err (!%p3069_p7)
}
  0x13   :  { %s3216_s7 = smov 512   ;;  %s3217_s8 = smov 32  }
  0x14   :  { %40 = dma.hbm_to_vmem [thread:$0]  %s3859_s1, 1024, %s35_s22, [#allocation9], %s3216_s7, %s3216_s7, %s3217_s8  }
  0x15   :  { %s3218_s11 = smov [#allocation5]   ;;  %s3073_s15 = scalar_lea.hbm %s3858_s0, 1024 }
  0x16   :  { %s22_s12 = sshll.u32 %s3218_s11, 4  ;;  %p3074_p8 = scmp.ne.s32.totalorder %s3858_s0, %s3073_s15  ;;  %s23_s12 = int_to_ptr.vmem [resolvable:$true] %s22_s12 }
  0x17   :  { %p3077_p9 = scmp.lt.u32.totalorder %s3073_s15, %s3858_s0 }
  0x19   :  { %p3079_p10 = pnand %p3077_p9, %p3074_p8 }
  0x1b   :  { %3082 = shalt.err (!%p3079_p10)
}
  0x1c   :  { %s3083_s20 = scalar_lea.vmem %s23_s12, 1024  ;;  %p3088_p12 = scmp.lt.s32.totalorder %s23_s12, %s23_s12 }
  0x1d   :  { %p3084_p11 = scmp.ne.s32.totalorder %s23_s12, %s3083_s20  ;;  %p3089_p13 = scmp.lt.s32.totalorder %s3083_s20, %s3083_s20 }
  0x1f   :  { %p3090_p0 = por %p3089_p13, %p3088_p12 }
  0x21   :  { %p3091_p1 = pnand %p3090_p0, %p3084_p11 }
  0x23   :  { %3094 = shalt.err (!%p3091_p1)
}
  0x24   :  { %s3219_s1 = smov 128   ;;  %s3220_s21 = smov 8  }
  0x25   :  { %28 = dma.hbm_to_vmem [thread:$0]  %s3858_s0, 1024, %s23_s12, [#allocation6], %s3219_s1, %s3219_s1, %s3220_s21  }
  0x26   :  { %s3221_s24 = smov [#allocation10]   ;;  %s3222_s26 = smov [#allocation11]  }
  0x27   :  { %s46_s25 = sshll.u32 %s3221_s24, 4  ;;  %s59_s27 = sshll.u32 %s3222_s26, 4  ;;  %s47_s25 = int_to_ptr.vmem [resolvable:$true] %s46_s25  ;;  %s60_s27 = int_to_ptr.vmem [resolvable:$true] %s59_s27 }
  0x28   :  { %s3095_s30 = scalar_lea.hbm %s3860_s2, 8192 }
  0x29   :  { %p3096_p2 = scmp.ne.s32.totalorder %s3860_s2, %s3095_s30  ;;  %p3099_p3 = scmp.lt.u32.totalorder %s3095_s30, %s3860_s2 }
  0x2b   :  { %p3101_p4 = pnand %p3099_p3, %p3096_p2 }
  0x2d   :  { %3104 = shalt.err (!%p3101_p4)
}
  0x2e   :  { %s3105_s0 = scalar_lea.vmem %s47_s25, 8192  ;;  %p3110_p6 = scmp.lt.s32.totalorder %s47_s25, %s47_s25 }
  0x2f   :  { %p3106_p5 = scmp.ne.s32.totalorder %s47_s25, %s3105_s0  ;;  %p3111_p7 = scmp.lt.s32.totalorder %s3105_s0, %s3105_s0 }
  0x31   :  { %p3112_p8 = por %p3111_p7, %p3110_p6 }
  0x33   :  { %p3113_p9 = pnand %p3112_p8, %p3106_p5 }
  0x35   :  { %3116 = shalt.err (!%p3113_p9)
}
  0x36   :  { %52 = dma.hbm_to_vmem [thread:$0]  %s3860_s2, 8192, %s47_s25, [#allocation9], %s3216_s7, %s3216_s7, %s3217_s8  }
  0x37   :  { %s3117_s17 = scalar_lea.hbm %s3861_s3, 64 }
  0x38   :  { %p3118_p10 = scmp.ne.s32.totalorder %s3861_s3, %s3117_s17  ;;  %p3121_p11 = scmp.lt.u32.totalorder %s3117_s17, %s3861_s3 }
  0x3a   :  { %p3123_p12 = pnand %p3121_p11, %p3118_p10 }
  0x3c   :  { %3126 = shalt.err (!%p3123_p12)
}
  0x3d   :  { %s3127_s23 = scalar_lea.vmem %s60_s27, 64  ;;  %p3132_p0 = scmp.lt.s32.totalorder %s60_s27, %s60_s27 }
  0x3e   :  { %p3128_p13 = scmp.ne.s32.totalorder %s60_s27, %s3127_s23  ;;  %p3133_p1 = scmp.lt.s32.totalorder %s3127_s23, %s3127_s23 }
  0x40   :  { %p3134_p2 = por %p3133_p1, %p3132_p0 }
  0x42   :  { %p3135_p3 = pnand %p3134_p2, %p3128_p13 }
  0x44   :  { %3138 = shalt.err (!%p3135_p3)
}
  0x45   :  { %62 = dma.hbm_to_vmem [thread:$0]  %s3861_s3, 64, %s60_s27, [#allocation12]  }
  0x46   :  { %3205 = dma.done.wait [#allocation6], 1024  }
  0x47   :  { %3206 = vsyncadd [#allocation6], 4294966272 }
  0x48   :  { %3207 = dma.done.wait [#allocation9], 9216  }
  0x49   :  { %3208 = vsyncadd [#allocation9], 4294958080 }
  0x4a   :  { %3209 = dma.done.wait [#allocation12], 64  }
  0x4b   :  { %3210 = vsyncadd [#allocation12], 4294967232  ;;  %v3223_v0 = vmov 0.0   ;;  %v90_v1 = vld [vmem:[#allocation8 + $0x8] sm:$0xff]  ;;  %v92_v3 = vld [vmem:[#allocation8 + $0x18] sm:$0xff]  ;;  %vm119_vm0 = vcmask 130048  }
  0x4c   :  { %208 = vmatprep.mubr.f32.mxu0 %v3223_v0  ;;  %321 = vmatprep.mubr.f32.mxu1 %v3223_v0  ;;  %v94_v2 = vld [vmem:[#allocation8 + $0x28] sm:$0xff]  ;;  %v96_v5 = vld [vmem:[#allocation8 + $0x38] sm:$0xff]  ;;  %v89_v6 = vld [vmem:[#allocation8] sm:$0xff]  ;;  %s3224_s3 = smov [#allocation14]   ;;  %s3225_s24 = smov [#allocation13]  }
  0x4d   :  { %v2375_v4 = vpack.c.bf16 %v94_v2, %v90_v1  ;;  %v93_v7 = vld [vmem:[#allocation8 + $0x20] sm:$0xff]  ;;  %v2379_v8 = vpack.c.bf16 %v96_v5, %v92_v3  ;;  %v91_v10 = vld [vmem:[#allocation8 + $0x10] sm:$0xff]  ;;  %v412_v14 = vld [vmem:[#allocation10 + $0x8] sm:$0xff]  ;;  %s2324_s8 = sshll.u32 %s3224_s3, 4  ;;  %s2311_s25 = sshll.u32 %s3225_s24, 4  ;;  %s2325_s8 = int_to_ptr.vmem [resolvable:$true] %s2324_s8  ;;  %s3805_s25 = int_to_ptr.vmem [resolvable:$true] %s2311_s25 }
  0x4e   :  { %v2377_v9 = vpack.c.bf16 %v93_v7, %v89_v6  ;;  %v95_v11 = vld [vmem:[#allocation8 + $0x30] sm:$0xff]  ;;  %v81_v12 = vld [vmem:[#allocation5] sm:$0xff]  ;;  %v416_v15 = vld [vmem:[#allocation10 + $0x28] sm:$0xff]  ;;  %s3226_s26 = smov [#allocation16]   ;;  %s3139_s28 = scalar_lea.vmem %s2325_s8, 128 }
  0x4f   :  { %2376 = vmatprep.subr.bf16.mxu0 %v2375_v4  ;;  %v2381_v13 = vpack.c.bf16 %v95_v11, %v91_v10  ;;  %v414_v16 = vld [vmem:[#allocation10 + $0x18] sm:$0xff]  ;;  %2380 = vmatprep.subr.bf16.mxu1 %v2379_v8  ;;  %v3321_v17 = vpack.c.bf16 %v416_v15, %v412_v14  ;;  %v411_v19 = vld [vmem:[#allocation10] sm:$0xff]  ;;  %v413_v23 = vld [vmem:[#allocation10 + $0x10] sm:$0xff]  ;;  %s2334_s27 = sshll.u32 %s3226_s26, 4  ;;  %p3140_p4 = scmp.ne.s32.totalorder %s2325_s8, %s3139_s28  ;;  %s3807_s27 = int_to_ptr.vmem [resolvable:$true] %s2334_s27 }
  0x50   :  { %2378 = vmatpush1.bf16.msra.mxu0 %v2377_v9  ;;  %v418_v18 = vld [vmem:[#allocation10 + $0x38] sm:$0xff]  ;;  %v415_v20 = vld [vmem:[#allocation10 + $0x20] sm:$0xff]  ;;  %v417_v24 = vld [vmem:[#allocation10 + $0x30] sm:$0xff]  ;;  %p3144_p5 = scmp.lt.s32.totalorder %s2325_s8, %s2325_s8  ;;  %p3145_p6 = scmp.lt.s32.totalorder %s3139_s28, %s3139_s28 }
  0x51   :  { %2382 = vmatpush1.bf16.msra.mxu1 %v2381_v13  ;;  %v3323_v21 = vpack.c.bf16 %v418_v18, %v414_v16  ;;  %v3325_v22 = vpack.c.bf16 %v415_v20, %v411_v19  ;;  %2384 = vmatprep.subr.bf16.mxu0 %v3321_v17  ;;  %v3328_v25 = vpack.c.bf16 %v417_v24, %v413_v23  ;;  %v420_v26 = vld [vmem:[#allocation10 + $0x48] sm:$0xff]  ;;  %v422_v28 = vld [vmem:[#allocation10 + $0x58] sm:$0xff]  ;;  %v419_v31 = vld [vmem:[#allocation10 + $0x40] sm:$0xff] }
  0x52   :  { %v424_v27 = vld [vmem:[#allocation10 + $0x68] sm:$0xff]  ;;  %v426_v30 = vld [vmem:[#allocation10 + $0x78] sm:$0xff]  ;;  %v423_v32 = vld [vmem:[#allocation10 + $0x60] sm:$0xff]  ;;  %p3146_p7 = por %p3145_p6, %p3144_p5 }
  0x53   :  { %2359 = vmatmul.mubr.msk.f32.vlgmr.msra.gmra.mrb[0].mxu0 %vm119_vm0, %v81_v12  ;;  %2416 = vmatprep.subr.bf16.mxu1 %v3323_v21  ;;  %v3332_v29 = vpack.c.bf16 %v424_v27, %v420_v26  ;;  %v82_v33 = vld [vmem:[#allocation5 + $0x8] sm:$0xff]  ;;  %v3336_v34 = vpack.c.bf16 %v426_v30, %v422_v28  ;;  %v3338_v35 = vpack.c.bf16 %v423_v32, %v419_v31  ;;  %v421_v36 = vld [vmem:[#allocation10 + $0x50] sm:$0xff]  ;;  %v430_v41 = vld [vmem:[#allocation10 + $0x98] sm:$0xff] }
  0x54   :  { %2367 = vmatmul.mubr.msk.f32.vlgmr.msra.gmra.mrb[0].mxu1 %vm119_vm0, %v81_v12  ;;  %2386 = vmatpush1.bf16.msra.mxu0 %v3325_v22  ;;  %v425_v37 = vld [vmem:[#allocation10 + $0x70] sm:$0xff]  ;;  %v428_v39 = vld [vmem:[#allocation10 + $0x88] sm:$0xff]  ;;  %v434_v43 = vld [vmem:[#allocation10 + $0xb8] sm:$0xff]  ;;  %p3147_p8 = pnand %p3146_p7, %p3140_p4 }
  0x55   :  { %2418 = vmatpush1.bf16.msra.mxu1 %v3328_v25  ;;  %214 = vmatprep.mubr.f32.mxu0 %v3223_v0  ;;  %v3342_v38 = vpack.c.bf16 %v425_v37, %v421_v36  ;;  %v432_v40 = vld [vmem:[#allocation10 + $0xa8] sm:$0xff]  ;;  %v427_v44 = vld [vmem:[#allocation10 + $0x80] sm:$0xff]  ;;  %v83_v46 = vld [vmem:[#allocation5 + $0x10] sm:$0xff]  ;;  %v3350_v47 = vpack.c.bf16 %v434_v43, %v430_v41 }
  0x56   :  { %327 = vmatprep.mubr.f32.mxu1 %v3223_v0  ;;  %2388 = vmatprep.subr.bf16.mxu0 %v3332_v29  ;;  %v3346_v42 = vpack.c.bf16 %v432_v40, %v428_v39  ;;  %v431_v45 = vld [vmem:[#allocation10 + $0xa0] sm:$0xff]  ;;  %v429_v48 = vld [vmem:[#allocation10 + $0x90] sm:$0xff]  ;;  %v436_v51 = vld [vmem:[#allocation10 + $0xc8] sm:$0xff] }
  0x57   :  { %2360 = vmatmul.mubr.msk.f32.gmra.mrb[2].mxu0 %vm119_vm0, %v82_v33  ;;  %2420 = vmatprep.subr.bf16.mxu1 %v3336_v34  ;;  %v433_v49 = vld [vmem:[#allocation10 + $0xb0] sm:$0xff]  ;;  %v3354_v50 = vpack.c.bf16 %v431_v45, %v427_v44  ;;  %v440_v52 = vld [vmem:[#allocation10 + $0xe8] sm:$0xff]  ;;  %v438_v53 = vld [vmem:[#allocation10 + $0xd8] sm:$0xff] }
  0x58   :  { %2368 = vmatmul.mubr.msk.f32.gmra.mrb[2].mxu1 %vm119_vm0, %v82_v33  ;;  %2390 = vmatpush1.bf16.msra.mxu0 %v3338_v35  ;;  %v3358_v54 = vpack.c.bf16 %v433_v49, %v429_v48  ;;  %v442_v55 = vld [vmem:[#allocation10 + $0xf8] sm:$0xff]  ;;  %v435_v56 = vld [vmem:[#allocation10 + $0xc0] sm:$0xff]  ;;  %v3362_v58 = vpack.c.bf16 %v440_v52, %v436_v51  ;;  %v437_v59 = vld [vmem:[#allocation10 + $0xd0] sm:$0xff] }
  0x59   :  { %2422 = vmatpush1.bf16.msra.mxu1 %v3342_v38  ;;  %220 = vmatprep.mubr.f32.mxu0 %v3223_v0  ;;  %v439_v57 = vld [vmem:[#allocation10 + $0xe0] sm:$0xff]  ;;  %v441_v60 = vld [vmem:[#allocation10 + $0xf0] sm:$0xff]  ;;  %v3366_v61 = vpack.c.bf16 %v442_v55, %v438_v53  ;;  %v444_v62 = vld [vmem:[#allocation10 + $0x108] sm:$0xff] }
  0x5a   :  { %333 = vmatprep.mubr.f32.mxu1 %v3223_v0  ;;  %2392 = vmatprep.subr.bf16.mxu0 %v3346_v42  ;;  %v448_v63 = vld [vmem:[#allocation10 + $0x128] sm:$0xff]  ;;  %v84_v1 = vld [vmem:[#allocation5 + $0x18] sm:$0xff]  ;;  %v3370_v2 = vpack.c.bf16 %v439_v57, %v435_v56  ;;  %v3374_v5 = vpack.c.bf16 %v441_v60, %v437_v59  ;;  %v443_v6 = vld [vmem:[#allocation10 + $0x100] sm:$0xff] }
  0x5b   :  { %2361 = vmatmul.mubr.msk.f32.gmra.mrb[4].mxu0 %vm119_vm0, %v83_v46  ;;  %2424 = vmatprep.subr.bf16.mxu1 %v3350_v47  ;;  %v446_v3 = vld [vmem:[#allocation10 + $0x118] sm:$0xff]  ;;  %v447_v7 = vld [vmem:[#allocation10 + $0x120] sm:$0xff]  ;;  %v3378_v8 = vpack.c.bf16 %v448_v63, %v444_v62  ;;  %v445_v9 = vld [vmem:[#allocation10 + $0x110] sm:$0xff] }
  0x5c   :  { %2369 = vmatmul.mubr.msk.f32.gmra.mrb[4].mxu1 %vm119_vm0, %v83_v46  ;;  %2394 = vmatpush1.bf16.msra.mxu0 %v3354_v50  ;;  %v450_v4 = vld [vmem:[#allocation10 + $0x138] sm:$0xff]  ;;  %v449_v10 = vld [vmem:[#allocation10 + $0x130] sm:$0xff]  ;;  %v452_v12 = vld [vmem:[#allocation10 + $0x148] sm:$0xff]  ;;  %v3386_v15 = vpack.c.bf16 %v447_v7, %v443_v6  ;;  %v99_v7 = vlaneseq }
  0x5d   :  { %2426 = vmatpush1.bf16.msra.mxu1 %v3358_v54  ;;  %226 = vmatprep.mubr.f32.mxu0 %v3223_v0  ;;  %v3382_v11 = vpack.c.bf16 %v450_v4, %v446_v3  ;;  %v456_v13 = vld [vmem:[#allocation10 + $0x168] sm:$0xff]  ;;  %v85_v14 = vld [vmem:[#allocation5 + $0x20] sm:$0xff]  ;;  %v454_v16 = vld [vmem:[#allocation10 + $0x158] sm:$0xff]  ;;  %v3390_v19 = vpack.c.bf16 %v449_v10, %v445_v9 }
  0x5e   :  { %339 = vmatprep.mubr.f32.mxu1 %v3223_v0  ;;  %2396 = vmatprep.subr.bf16.mxu0 %v3362_v58  ;;  %v458_v18 = vld [vmem:[#allocation10 + $0x178] sm:$0xff]  ;;  %v451_v20 = vld [vmem:[#allocation10 + $0x140] sm:$0xff]  ;;  %v3394_v24 = vpack.c.bf16 %v456_v13, %v452_v12  ;;  %v453_v26 = vld [vmem:[#allocation10 + $0x150] sm:$0xff]  ;;  %v100_v9 = vshrl.u32 %v99_v7, 7 }
  0x5f   :  { %2362 = vmatmul.mubr.msk.f32.gmra.mrb[6].mxu0 %vm119_vm0, %v84_v1  ;;  %2428 = vmatprep.subr.bf16.mxu1 %v3366_v61  ;;  %v455_v23 = vld [vmem:[#allocation10 + $0x160] sm:$0xff]  ;;  %v457_v27 = vld [vmem:[#allocation10 + $0x170] sm:$0xff]  ;;  %v3398_v28 = vpack.c.bf16 %v458_v18, %v454_v16  ;;  %v460_v30 = vld [vmem:[#allocation10 + $0x188] sm:$0xff] }
  0x60   :  { %2370 = vmatmul.mubr.msk.f32.gmra.mrb[6].mxu1 %vm119_vm0, %v84_v1  ;;  %2398 = vmatpush1.bf16.msra.mxu0 %v3370_v2  ;;  %v464_v31 = vld [vmem:[#allocation10 + $0x1a8] sm:$0xff]  ;;  %v3402_v33 = vpack.c.bf16 %v455_v23, %v451_v20  ;;  %v462_v36 = vld [vmem:[#allocation10 + $0x198] sm:$0xff]  ;;  %v3406_v39 = vpack.c.bf16 %v457_v27, %v453_v26  ;;  %v459_v40 = vld [vmem:[#allocation10 + $0x180] sm:$0xff]  ;;  %v101_v10 = vsub.s32 0, %v100_v9  ;;  %v105_v13 = vsub.s32 1, %v100_v9 }
  0x61   :  { %2430 = vmatpush1.bf16.msra.mxu1 %v3374_v5  ;;  %232 = vmatprep.mubr.f32.mxu0 %v3223_v0  ;;  %v86_v32 = vld [vmem:[#allocation5 + $0x28] sm:$0xff]  ;;  %v466_v37 = vld [vmem:[#allocation10 + $0x1b8] sm:$0xff]  ;;  %v463_v41 = vld [vmem:[#allocation10 + $0x1a0] sm:$0xff]  ;;  %v3410_v43 = vpack.c.bf16 %v464_v31, %v460_v30  ;;  %v109_v16 = vsub.s32 2, %v100_v9 }
  0x62   :  { %345 = vmatprep.mubr.f32.mxu1 %v3223_v0  ;;  %2400 = vmatprep.subr.bf16.mxu0 %v3378_v8  ;;  %v461_v44 = vld [vmem:[#allocation10 + $0x190] sm:$0xff]  ;;  %v3414_v46 = vpack.c.bf16 %v466_v37, %v462_v36  ;;  %v468_v48 = vld [vmem:[#allocation10 + $0x1c8] sm:$0xff]  ;;  %v3418_v52 = vpack.c.bf16 %v463_v41, %v459_v40  ;;  %v470_v53 = vld [vmem:[#allocation10 + $0x1d8] sm:$0xff] }
  0x63   :  { %2363 = vmatmul.mubr.msk.f32.gmra.mrb[8].mxu0 %vm119_vm0, %v85_v14  ;;  %2432 = vmatprep.subr.bf16.mxu1 %v3382_v11  ;;  %v465_v45 = vld [vmem:[#allocation10 + $0x1b0] sm:$0xff]  ;;  %v472_v49 = vld [vmem:[#allocation10 + $0x1e8] sm:$0xff]  ;;  %v474_v55 = vld [vmem:[#allocation10 + $0x1f8] sm:$0xff] }
  0x64   :  { %2371 = vmatmul.mubr.msk.f32.gmra.mrb[8].mxu1 %vm119_vm0, %v85_v14  ;;  %2402 = vmatpush1.bf16.msra.mxu0 %v3386_v15  ;;  %v87_v51 = vld [vmem:[#allocation5 + $0x30] sm:$0xff]  ;;  %v3422_v56 = vpack.c.bf16 %v465_v45, %v461_v44  ;;  %v467_v57 = vld [vmem:[#allocation10 + $0x1c0] sm:$0xff]  ;;  %v3426_v60 = vpack.c.bf16 %v472_v49, %v468_v48  ;;  %v3430_v1 = vpack.c.bf16 %v474_v55, %v470_v53  ;;  %v88_v3 = vld [vmem:[#allocation5 + $0x38] sm:$0xff] }
  0x65   :  { %2434 = vmatpush1.bf16.msra.mxu1 %v3390_v19  ;;  %238 = vmatprep.mubr.f32.mxu0 %v3223_v0  ;;  %v471_v59 = vld [vmem:[#allocation10 + $0x1e0] sm:$0xff]  ;;  %v469_v62 = vld [vmem:[#allocation10 + $0x1d0] sm:$0xff] }
  0x66   :  { %351 = vmatprep.mubr.f32.mxu1 %v3223_v0  ;;  %2404 = vmatprep.subr.bf16.mxu0 %v3394_v24  ;;  %v473_v63 = vld [vmem:[#allocation10 + $0x1f0] sm:$0xff]  ;;  %v3434_v4 = vpack.c.bf16 %v471_v59, %v467_v57  ;;  %v97_v12 = vld [vmem:[#allocation11] sm:$0xf] }
  0x67   :  { %2364 = vmatmul.mubr.msk.f32.gmra.mrb[10].mxu0 %vm119_vm0, %v86_v32  ;;  %2436 = vmatprep.subr.bf16.mxu1 %v3398_v28  ;;  %v3438_v6 = vpack.c.bf16 %v473_v63, %v469_v62  ;;  %v3487_v14 = vrot.slane %v97_v12, %v101_v10  ;;  %v3489_v18 = vrot.slane %v97_v12, %v105_v13 }
  0x68   :  { %2372 = vmatmul.mubr.msk.f32.gmra.mrb[10].mxu1 %vm119_vm0, %v86_v32  ;;  %2406 = vmatpush1.bf16.msra.mxu0 %v3402_v33  ;;  %v3492_v26 = vrot.slane %v97_v12, %v109_v16 }
  0x69   :  { %2438 = vmatpush1.bf16.msra.mxu1 %v3406_v39  ;;  %244 = vmatprep.mubr.f32.mxu0 %v3223_v0 }
  0x6a   :  { %357 = vmatprep.mubr.f32.mxu1 %v3223_v0  ;;  %2408 = vmatprep.subr.bf16.mxu0 %v3410_v43 }
  0x6b   :  { %2365 = vmatmul.mubr.msk.f32.gmra.mrb[12].mxu0 %vm119_vm0, %v87_v51  ;;  %2440 = vmatprep.subr.bf16.mxu1 %v3414_v46 }
  0x6c   :  { %2373 = vmatmul.mubr.msk.f32.gmra.mrb[12].mxu1 %vm119_vm0, %v87_v51  ;;  %2410 = vmatpush1.bf16.msra.mxu0 %v3418_v52 }
  0x6d   :  { %2442 = vmatpush1.bf16.msra.mxu1 %v3422_v56  ;;  %250 = vmatprep.mubr.f32.mxu0 %v3223_v0 }
  0x6e   :  { %363 = vmatprep.mubr.f32.mxu1 %v3223_v0  ;;  %2412 = vmatprep.subr.bf16.mxu0 %v3426_v60 }
  0x6f   :  { %2366 = vmatmul.mubr.msk.f32.gmra.mrb[14].mxu0 %vm119_vm0, %v88_v3  ;;  %2444 = vmatprep.subr.bf16.mxu1 %v3430_v1 }
  0x70   :  { %2374 = vmatmul.mubr.msk.f32.gmra.mrb[14].mxu1 %vm119_vm0, %v88_v3  ;;  %2414 = vmatpush1.bf16.msra.mxu0 %v3434_v4 }
  0x71   :  { %2446 = vmatpush1.bf16.msra.mxu1 %v3438_v6  ;;  %539 = vmatprep.mubr.f32.mxu0 %v3223_v0 }
  0x72   :  { %610 = vmatprep.mubr.f32.mxu1 %v3223_v0  ;;  %2448 = vmatprep.subr.bf16.mxu0 %v3321_v17 }
  0x73   :  { %540 = vmatmul.mubr.f32.vlgmr.msra.gmra.mrb[0].mxu0 %v3223_v0  ;;  %2480 = vmatprep.subr.bf16.mxu1 %v3323_v21 }
  0x74   :  { %611 = vmatmul.mubr.f32.vlgmr.msra.gmra.mrb[0].mxu1 %v3223_v0  ;;  %2450 = vmatpush1.bf16.msra.mxu0 %v3325_v22 }
  0x75   :  { %2482 = vmatpush1.bf16.msra.mxu1 %v3328_v25  ;;  %2452 = vmatprep.subr.bf16.mxu0 %v3332_v29 }
  0x76   :  { %2484 = vmatprep.subr.bf16.mxu1 %v3336_v34  ;;  %775 = vmatprep.mubr.f32.mxu0 %v3223_v0 }
  0x77   :  { %846 = vmatprep.mubr.f32.mxu1 %v3223_v0 }
  0x78   :  { %2454 = vmatpush1.bf16.msra.mxu0 %v3338_v35 }
  0x79   :  { %2486 = vmatpush1.bf16.msra.mxu1 %v3342_v38  ;;  %2456 = vmatprep.subr.bf16.mxu0 %v3346_v42 }
  0x7a   :  { %2488 = vmatprep.subr.bf16.mxu1 %v3350_v47 }
  0x7c   :  { %2458 = vmatpush1.bf16.msra.mxu0 %v3354_v50 }
  0x7d   :  { %2490 = vmatpush1.bf16.msra.mxu1 %v3358_v54  ;;  %2460 = vmatprep.subr.bf16.mxu0 %v3362_v58 }
  0x7e   :  { %2492 = vmatprep.subr.bf16.mxu1 %v3366_v61 }
  0x80   :  { %2462 = vmatpush1.bf16.msra.mxu0 %v3370_v2 }
  0x81   :  { %2494 = vmatpush1.bf16.msra.mxu1 %v3374_v5  ;;  %2464 = vmatprep.subr.bf16.mxu0 %v3378_v8 }
  0x82   :  { %2496 = vmatprep.subr.bf16.mxu1 %v3382_v11 }
  0x84   :  { %2466 = vmatpush1.bf16.msra.mxu0 %v3386_v15 }
  0x85   :  { %2498 = vmatpush1.bf16.msra.mxu1 %v3390_v19  ;;  %2468 = vmatprep.subr.bf16.mxu0 %v3394_v24 }
  0x86   :  { %2500 = vmatprep.subr.bf16.mxu1 %v3398_v28 }
  0x88   :  { %2470 = vmatpush1.bf16.msra.mxu0 %v3402_v33 }
  0x89   :  { %2502 = vmatpush1.bf16.msra.mxu1 %v3406_v39  ;;  %2472 = vmatprep.subr.bf16.mxu0 %v3410_v43 }
  0x8a   :  { %2504 = vmatprep.subr.bf16.mxu1 %v3414_v46 }
  0x8c   :  { %2474 = vmatpush1.bf16.msra.mxu0 %v3418_v52 }
  0x8d   :  { %2506 = vmatpush1.bf16.msra.mxu1 %v3422_v56  ;;  %2476 = vmatprep.subr.bf16.mxu0 %v3426_v60 }
  0x8e   :  { %2508 = vmatprep.subr.bf16.mxu1 %v3430_v1 }
  0x90   :  { %2478 = vmatpush1.bf16.msra.mxu0 %v3434_v4 }
  0x91   :  { %2510 = vmatpush1.bf16.msra.mxu1 %v3438_v6  ;;  %2512 = vmatprep.subr.bf16.mxu0 %v3321_v17  ;;  %v113_v17 = vsub.s32 3, %v100_v9 }
  0x92   :  { %2544 = vmatprep.subr.bf16.mxu1 %v3323_v21 }
  0x93   :  { %v3496_v40 = vrot.slane %v97_v12, %v113_v17 }
 0x146   :  { %v541_v20 = vpop.f32.mrb[0].mxu0 }
 0x147   :  { %v2895_v23 = vadd.f32 %v541_v20, %v3487_v14  ;;  %v612_v27 = vpop.f32.mrb[0].mxu1  ;;  %v543_v30 = vpop.f32.mrb[1].mxu0 }
 0x148   :  { %v2896_v21 = vadd.f32 %v543_v30, %v3489_v18  ;;  %v614_v31 = vpop.f32.mrb[1].mxu1  ;;  %v2911_v37 = vadd.f32 %v612_v27, %v3492_v26 }
 0x149   :  { %v621_v32 = vmul.f32 0.5, %v2895_v23  ;;  %v2912_v41 = vadd.f32 %v614_v31, %v3496_v40 }
 0x14a   :  { %v625_v36 = vmul.f32 0.5, %v2896_v21 }
 0x14b   :  { %2971 = vtanh.f32 %v621_v32  ;;  %v633_v44 = vmul.f32 0.5, %v2912_v41 }
 0x14c   :  { %2973 = vtanh.f32 %v625_v36 }
 0x14d   :  { %2975 = vtanh.f32 %v2911_v37 }
 0x14e   :  { %2977 = vtanh.f32 %v633_v44 }
 0x155   :  { %v2972_v45 = vpop.eup %2971 }
 0x156   :  { %v2974_v48 = vpop.eup %2973  ;;  %v623_v49 = vadd.f32 1.0, %v2972_v45 }
 0x157   :  { %v627_v51 = vadd.f32 1.0, %v2974_v48  ;;  %v2976_v55 = vpop.eup %2975 }
 0x158   :  { %v624_v53 = vmul.f32 0.5, %v623_v49  ;;  %v2978_v3 = vpop.eup %2977  ;;  %v1122_v49 = vld [vmem:[#allocation10 + $0x8] sm:$0xff] }
 0x159   :  { %v628_v57 = vmul.f32 0.5, %v627_v51  ;;  %v635_v7 = vadd.f32 1.0, %v2978_v3  ;;  %v1126_v51 = vld [vmem:[#allocation10 + $0x28] sm:$0xff] }
 0x15a   :  { %v631_v59 = vmul.f32 %v2976_v55, %v624_v53  ;;  %v1124_v53 = vld [vmem:[#allocation10 + $0x18] sm:$0xff]  ;;  %v3544_v55 = vpack.c.bf16 %v1126_v51, %v1122_v49 }
 0x15b   :  { %v630_v62 = vmul.f32 0.0, %v628_v57  ;;  %v636_v9 = vmul.f32 0.5, %v635_v7  ;;  %v1128_v57 = vld [vmem:[#allocation10 + $0x38] sm:$0xff]  ;;  %v1123_v7 = vld [vmem:[#allocation10 + $0x10] sm:$0xff] }
 0x15d   :  { %v3499_v63 = vadd.f32 %v631_v59, %v630_v62  ;;  %v1121_v59 = vld [vmem:[#allocation10] sm:$0xff] }
 0x15e   :  { %v1125_v62 = vld [vmem:[#allocation10 + $0x20] sm:$0xff] }
 0x15f   :  { %2979 = vtanh.f32 %v3499_v63  ;;  %v3548_v3 = vpack.c.bf16 %v1125_v62, %v1121_v59  ;;  %v1387_v59 = vld [vmem:[#allocation10 + $0xe8] sm:$0xff]  ;;  %v1385_v62 = vld [vmem:[#allocation10 + $0xd8] sm:$0xff] }
 0x169   :  { %v2980_v10 = vpop.eup %2979 }
 0x16a   :  { %v638_v12 = vmul.f32 %v2980_v10, %v636_v9  ;;  %v1127_v9 = vld [vmem:[#allocation10 + $0x30] sm:$0xff] }
 0x16b   :  { %v3551_v10 = vpack.c.bf16 %v1127_v9, %v1123_v7  ;;  %v1389_v9 = vld [vmem:[#allocation10 + $0xf8] sm:$0xff] }
 0x16c   :  { %639 = vst [vmem:[#allocation13] sm:$0xff] %v638_v12  ;;  %776 = vmatmul.mubr.f32.vlgmr.msra.gmra.mrb[2].mxu0 %v638_v12  ;;  %847 = vmatmul.mubr.f32.vlgmr.msra.gmra.mrb[2].mxu1 %v638_v12  ;;  %v1130_v12 = vld [vmem:[#allocation10 + $0x48] sm:$0xff] }
 0x16d   :  { %2514 = vmatpush1.bf16.msra.mxu0 %v3325_v22  ;;  %2546 = vmatpush1.bf16.msra.mxu1 %v3328_v25 }
 0x16e   :  { %2516 = vmatprep.subr.bf16.mxu0 %v3332_v29  ;;  %2548 = vmatprep.subr.bf16.mxu1 %v3336_v34 }
 0x16f   :  { %1012 = vmatprep.mubr.f32.mxu0 %v3223_v0  ;;  %1083 = vmatprep.mubr.f32.mxu1 %v3223_v0 }
 0x171   :  { %2518 = vmatpush1.bf16.msra.mxu0 %v3338_v35  ;;  %2550 = vmatpush1.bf16.msra.mxu1 %v3342_v38 }
 0x172   :  { %2520 = vmatprep.subr.bf16.mxu0 %v3346_v42  ;;  %2552 = vmatprep.subr.bf16.mxu1 %v3350_v47 }
 0x175   :  { %2522 = vmatpush1.bf16.msra.mxu0 %v3354_v50  ;;  %2554 = vmatpush1.bf16.msra.mxu1 %v3358_v54 }
 0x176   :  { %2524 = vmatprep.subr.bf16.mxu0 %v3362_v58  ;;  %2556 = vmatprep.subr.bf16.mxu1 %v3366_v61 }
 0x179   :  { %2526 = vmatpush1.bf16.msra.mxu0 %v3370_v2  ;;  %2558 = vmatpush1.bf16.msra.mxu1 %v3374_v5 }
 0x17a   :  { %2528 = vmatprep.subr.bf16.mxu0 %v3378_v8  ;;  %2560 = vmatprep.subr.bf16.mxu1 %v3382_v11 }
 0x17d   :  { %2530 = vmatpush1.bf16.msra.mxu0 %v3386_v15  ;;  %2562 = vmatpush1.bf16.msra.mxu1 %v3390_v19 }
 0x17e   :  { %2532 = vmatprep.subr.bf16.mxu0 %v3394_v24  ;;  %2564 = vmatprep.subr.bf16.mxu1 %v3398_v28 }
 0x181   :  { %2534 = vmatpush1.bf16.msra.mxu0 %v3402_v33  ;;  %2566 = vmatpush1.bf16.msra.mxu1 %v3406_v39 }
 0x182   :  { %2536 = vmatprep.subr.bf16.mxu0 %v3410_v43  ;;  %2568 = vmatprep.subr.bf16.mxu1 %v3414_v46 }
 0x185   :  { %2538 = vmatpush1.bf16.msra.mxu0 %v3418_v52  ;;  %2570 = vmatpush1.bf16.msra.mxu1 %v3422_v56 }
 0x186   :  { %2540 = vmatprep.subr.bf16.mxu0 %v3426_v60  ;;  %2572 = vmatprep.subr.bf16.mxu1 %v3430_v1 }
 0x189   :  { %2542 = vmatpush1.bf16.msra.mxu0 %v3434_v4  ;;  %2574 = vmatpush1.bf16.msra.mxu1 %v3438_v6 }
 0x18a   :  { %2576 = vmatprep.subr.bf16.mxu0 %v3544_v55 }
 0x23f   :  { %v777_v22 = vpop.f32.mrb[2].mxu0  ;;  %v848_v25 = vpop.f32.mrb[2].mxu1 }
 0x240   :  { %v2897_v29 = vadd.f32 %v777_v22, %v3487_v14  ;;  %v779_v34 = vpop.f32.mrb[3].mxu0  ;;  %v850_v35 = vpop.f32.mrb[3].mxu1  ;;  %v2913_v50 = vadd.f32 %v848_v25, %v3492_v26  ;;  %v1134_v22 = vld [vmem:[#allocation10 + $0x68] sm:$0xff]  ;;  %v1132_v25 = vld [vmem:[#allocation10 + $0x58] sm:$0xff] }
 0x241   :  { %v2898_v38 = vadd.f32 %v779_v34, %v3489_v18  ;;  %v2914_v54 = vadd.f32 %v850_v35, %v3496_v40  ;;  %v1136_v34 = vld [vmem:[#allocation10 + $0x78] sm:$0xff]  ;;  %v1129_v35 = vld [vmem:[#allocation10 + $0x40] sm:$0xff] }
 0x242   :  { %v857_v42 = vmul.f32 0.5, %v2897_v29  ;;  %v3556_v29 = vpack.c.bf16 %v1134_v22, %v1130_v12  ;;  %v1382_v12 = vld [vmem:[#allocation10 + $0xc0] sm:$0xff] }
 0x243   :  { %v861_v47 = vmul.f32 0.5, %v2898_v38  ;;  %v869_v13 = vmul.f32 0.5, %v2914_v54  ;;  %v1133_v38 = vld [vmem:[#allocation10 + $0x60] sm:$0xff]  ;;  %v1135_v54 = vld [vmem:[#allocation10 + $0x70] sm:$0xff] }
 0x244   :  { %2981 = vtanh.f32 %v857_v42  ;;  %v3558_v42 = vpack.c.bf16 %v1136_v34, %v1132_v25  ;;  %v1386_v22 = vld [vmem:[#allocation10 + $0xe0] sm:$0xff]  ;;  %v3624_v25 = vpack.c.bf16 %v1389_v9, %v1385_v62  ;;  %v1415_v62 = vld [vmem:[#allocation10 + $0x1c8] sm:$0xff] }
 0x245   :  { %2983 = vtanh.f32 %v861_v47  ;;  %v3560_v47 = vpack.c.bf16 %v1133_v38, %v1129_v35  ;;  %v3626_v34 = vpack.c.bf16 %v1386_v22, %v1382_v12  ;;  %v1384_v35 = vld [vmem:[#allocation10 + $0xd0] sm:$0xff]  ;;  %v1419_v9 = vld [vmem:[#allocation10 + $0x1e8] sm:$0xff]  ;;  %v1417_v12 = vld [vmem:[#allocation10 + $0x1d8] sm:$0xff] }
 0x246   :  { %2985 = vtanh.f32 %v2913_v50  ;;  %v1131_v50 = vld [vmem:[#allocation10 + $0x50] sm:$0xff]  ;;  %v3670_v22 = vpack.c.bf16 %v1419_v9, %v1415_v62 }
 0x247   :  { %2987 = vtanh.f32 %v869_v13  ;;  %v3563_v13 = vpack.c.bf16 %v1135_v54, %v1131_v50  ;;  %v1388_v38 = vld [vmem:[#allocation10 + $0xf0] sm:$0xff]  ;;  %v1391_v54 = vld [vmem:[#allocation10 + $0x108] sm:$0xff] }
 0x248   :  { %v3629_v50 = vpack.c.bf16 %v1388_v38, %v1384_v35  ;;  %v1421_v35 = vld [vmem:[#allocation10 + $0x1f8] sm:$0xff]  ;;  %v1414_v38 = vld [vmem:[#allocation10 + $0x1c0] sm:$0xff] }
 0x24e   :  { %v2982_v16 = vpop.eup %2981 }
 0x24f   :  { %v2984_v20 = vpop.eup %2983  ;;  %v859_v23 = vadd.f32 1.0, %v2982_v16  ;;  %v1138_v16 = vld [vmem:[#allocation10 + $0x88] sm:$0xff] }
 0x250   :  { %v863_v27 = vadd.f32 1.0, %v2984_v20  ;;  %v2986_v17 = vpop.eup %2985  ;;  %v1142_v20 = vld [vmem:[#allocation10 + $0xa8] sm:$0xff] }
 0x251   :  { %v860_v30 = vmul.f32 0.5, %v859_v23  ;;  %v2988_v37 = vpop.eup %2987  ;;  %v1140_v23 = vld [vmem:[#allocation10 + $0x98] sm:$0xff] }
 0x252   :  { %v864_v21 = vmul.f32 0.5, %v863_v27  ;;  %v871_v41 = vadd.f32 1.0, %v2988_v37  ;;  %v3568_v27 = vpack.c.bf16 %v1142_v20, %v1138_v16  ;;  %v1139_v37 = vld [vmem:[#allocation10 + $0x90] sm:$0xff]  ;;  %v1395_v16 = vld [vmem:[#allocation10 + $0x128] sm:$0xff]  ;;  %v1393_v20 = vld [vmem:[#allocation10 + $0x118] sm:$0xff] }
 0x253   :  { %v867_v31 = vmul.f32 %v2986_v17, %v860_v30  ;;  %v1144_v30 = vld [vmem:[#allocation10 + $0xb8] sm:$0xff]  ;;  %v1137_v17 = vld [vmem:[#allocation10 + $0x80] sm:$0xff] }
 0x254   :  { %v866_v32 = vmul.f32 %v864_v21, %v3499_v63  ;;  %v872_v44 = vmul.f32 0.5, %v871_v41  ;;  %v3546_v63 = vpack.c.bf16 %v1128_v57, %v1124_v53  ;;  %v1141_v21 = vld [vmem:[#allocation10 + $0xa0] sm:$0xff]  ;;  %v1143_v41 = vld [vmem:[#allocation10 + $0xb0] sm:$0xff] }
 0x256   :  { %v3539_v36 = vadd.f32 %v867_v31, %v866_v32  ;;  %2608 = vmatprep.subr.bf16.mxu1 %v3546_v63  ;;  %v3570_v31 = vpack.c.bf16 %v1144_v30, %v1140_v23  ;;  %v3572_v32 = vpack.c.bf16 %v1141_v21, %v1137_v17  ;;  %v3634_v23 = vpack.c.bf16 %v1395_v16, %v1391_v54  ;;  %v1397_v30 = vld [vmem:[#allocation10 + $0x138] sm:$0xff]  ;;  %v1390_v17 = vld [vmem:[#allocation10 + $0x100] sm:$0xff] }
 0x257   :  { %v1394_v21 = vld [vmem:[#allocation10 + $0x120] sm:$0xff]  ;;  %v3672_v16 = vpack.c.bf16 %v1421_v35, %v1417_v12 }
 0x258   :  { %2989 = vtanh.f32 %v3539_v36  ;;  %v1418_v54 = vld [vmem:[#allocation10 + $0x1e0] sm:$0xff] }
 0x262   :  { %v2990_v45 = vpop.eup %2989 }
 0x263   :  { %v874_v48 = vmul.f32 %v2990_v45, %v872_v44  ;;  %v3575_v44 = vpack.c.bf16 %v1143_v41, %v1139_v37  ;;  %v3636_v37 = vpack.c.bf16 %v1397_v30, %v1393_v20  ;;  %v3638_v41 = vpack.c.bf16 %v1394_v21, %v1390_v17  ;;  %v1416_v30 = vld [vmem:[#allocation10 + $0x1d0] sm:$0xff] }
 0x264   :  { %v3674_v20 = vpack.c.bf16 %v1418_v54, %v1414_v38  ;;  %v1420_v17 = vld [vmem:[#allocation10 + $0x1f0] sm:$0xff] }
 0x265   :  { %876 = vst [vmem:[#allocation13 + $0x8] sm:$0xff] %v874_v48  ;;  %1013 = vmatmul.mubr.f32.vlgmr.msra.gmra.mrb[4].mxu0 %v874_v48  ;;  %1084 = vmatmul.mubr.f32.vlgmr.msra.gmra.mrb[4].mxu1 %v874_v48  ;;  %v3677_v21 = vpack.c.bf16 %v1420_v17, %v1416_v30 }
 0x266   :  { %1249 = vmatprep.mubr.f32.mxu0 %v3223_v0  ;;  %1320 = vmatprep.mubr.f32.mxu1 %v3223_v0 }
 0x267   :  { %2578 = vmatpush1.bf16.msra.mxu0 %v3548_v3  ;;  %2610 = vmatpush1.bf16.msra.mxu1 %v3551_v10 }
 0x268   :  { %2580 = vmatprep.subr.bf16.mxu0 %v3556_v29  ;;  %2612 = vmatprep.subr.bf16.mxu1 %v3558_v42 }
 0x26b   :  { %2582 = vmatpush1.bf16.msra.mxu0 %v3560_v47  ;;  %2614 = vmatpush1.bf16.msra.mxu1 %v3563_v13 }
 0x26c   :  { %2584 = vmatprep.subr.bf16.mxu0 %v3568_v27  ;;  %2616 = vmatprep.subr.bf16.mxu1 %v3570_v31 }
 0x26f   :  { %2586 = vmatpush1.bf16.msra.mxu0 %v3572_v32  ;;  %2618 = vmatpush1.bf16.msra.mxu1 %v3575_v44 }
 0x270   :  { %2588 = vmatprep.subr.bf16.mxu0 %v3362_v58  ;;  %2620 = vmatprep.subr.bf16.mxu1 %v3366_v61 }
 0x273   :  { %2590 = vmatpush1.bf16.msra.mxu0 %v3370_v2  ;;  %2622 = vmatpush1.bf16.msra.mxu1 %v3374_v5 }
 0x274   :  { %2592 = vmatprep.subr.bf16.mxu0 %v3378_v8  ;;  %2624 = vmatprep.subr.bf16.mxu1 %v3382_v11 }
 0x277   :  { %2594 = vmatpush1.bf16.msra.mxu0 %v3386_v15  ;;  %2626 = vmatpush1.bf16.msra.mxu1 %v3390_v19 }
 0x278   :  { %2596 = vmatprep.subr.bf16.mxu0 %v3394_v24  ;;  %2628 = vmatprep.subr.bf16.mxu1 %v3398_v28 }
 0x27b   :  { %2598 = vmatpush1.bf16.msra.mxu0 %v3402_v33  ;;  %2630 = vmatpush1.bf16.msra.mxu1 %v3406_v39 }
 0x27c   :  { %2600 = vmatprep.subr.bf16.mxu0 %v3410_v43  ;;  %2632 = vmatprep.subr.bf16.mxu1 %v3414_v46 }
 0x27f   :  { %2602 = vmatpush1.bf16.msra.mxu0 %v3418_v52  ;;  %2634 = vmatpush1.bf16.msra.mxu1 %v3422_v56 }
 0x280   :  { %2604 = vmatprep.subr.bf16.mxu0 %v3426_v60  ;;  %2636 = vmatprep.subr.bf16.mxu1 %v3430_v1 }
 0x283   :  { %2606 = vmatpush1.bf16.msra.mxu0 %v3434_v4  ;;  %2638 = vmatpush1.bf16.msra.mxu1 %v3438_v6 }
 0x284   :  { %2640 = vmatprep.subr.bf16.mxu0 %v3544_v55  ;;  %2672 = vmatprep.subr.bf16.mxu1 %v3546_v63 }
 0x338   :  { %v1014_v58 = vpop.f32.mrb[4].mxu0  ;;  %v1085_v61 = vpop.f32.mrb[4].mxu1 }
 0x339   :  { %v2899_v2 = vadd.f32 %v1014_v58, %v3487_v14  ;;  %v1016_v5 = vpop.f32.mrb[5].mxu0  ;;  %v1087_v8 = vpop.f32.mrb[5].mxu1  ;;  %v2915_v24 = vadd.f32 %v1085_v61, %v3492_v26  ;;  %v1392_v58 = vld [vmem:[#allocation10 + $0x110] sm:$0xff] }
 0x33a   :  { %v2900_v11 = vadd.f32 %v1016_v5, %v3489_v18  ;;  %v2916_v28 = vadd.f32 %v1087_v8, %v3496_v40  ;;  %v1396_v61 = vld [vmem:[#allocation10 + $0x130] sm:$0xff]  ;;  %v1399_v5 = vld [vmem:[#allocation10 + $0x148] sm:$0xff] }
 0x33b   :  { %v1094_v15 = vmul.f32 0.5, %v2899_v2  ;;  %v3641_v2 = vpack.c.bf16 %v1396_v61, %v1392_v58  ;;  %v1403_v8 = vld [vmem:[#allocation10 + $0x168] sm:$0xff] }
 0x33c   :  { %v1098_v19 = vmul.f32 0.5, %v2900_v11  ;;  %v1106_v33 = vmul.f32 0.5, %v2916_v28  ;;  %v1401_v11 = vld [vmem:[#allocation10 + $0x158] sm:$0xff]  ;;  %v1402_v28 = vld [vmem:[#allocation10 + $0x160] sm:$0xff] }
 0x33d   :  { %2991 = vtanh.f32 %v1094_v15  ;;  %v3646_v15 = vpack.c.bf16 %v1403_v8, %v1399_v5 }
 0x33e   :  { %2993 = vtanh.f32 %v1098_v19  ;;  %v1405_v19 = vld [vmem:[#allocation10 + $0x178] sm:$0xff] }
 0x33f   :  { %2995 = vtanh.f32 %v2915_v24  ;;  %v1398_v24 = vld [vmem:[#allocation10 + $0x140] sm:$0xff] }
 0x340   :  { %2997 = vtanh.f32 %v1106_v33  ;;  %v3648_v33 = vpack.c.bf16 %v1405_v19, %v1401_v11 }
 0x347   :  { %v2992_v39 = vpop.eup %2991 }
 0x348   :  { %v2994_v43 = vpop.eup %2993  ;;  %v1096_v46 = vadd.f32 1.0, %v2992_v39  ;;  %v3650_v39 = vpack.c.bf16 %v1402_v28, %v1398_v24 }
 0x349   :  { %v1100_v52 = vadd.f32 1.0, %v2994_v43  ;;  %v2996_v60 = vpop.eup %2995  ;;  %v1400_v43 = vld [vmem:[#allocation10 + $0x150] sm:$0xff] }
 0x34a   :  { %v1097_v56 = vmul.f32 0.5, %v1096_v46  ;;  %v2998_v48 = vpop.eup %2997  ;;  %v1404_v46 = vld [vmem:[#allocation10 + $0x170] sm:$0xff] }
 0x34b   :  { %v1101_v1 = vmul.f32 0.5, %v1100_v52  ;;  %v1108_v49 = vadd.f32 1.0, %v2998_v48  ;;  %v3653_v52 = vpack.c.bf16 %v1404_v46, %v1400_v43  ;;  %v1406_v48 = vld [vmem:[#allocation10 + $0x180] sm:$0xff] }
 0x34c   :  { %v1104_v4 = vmul.f32 %v2996_v60, %v1097_v56  ;;  %v1407_v56 = vld [vmem:[#allocation10 + $0x188] sm:$0xff] }
 0x34d   :  { %v1103_v6 = vmul.f32 %v1101_v1, %v3539_v36  ;;  %v1109_v51 = vmul.f32 0.5, %v1108_v49  ;;  %v1383_v36 = vld [vmem:[#allocation10 + $0xc8] sm:$0xff]  ;;  %v1409_v1 = vld [vmem:[#allocation10 + $0x198] sm:$0xff]  ;;  %v1410_v49 = vld [vmem:[#allocation10 + $0x1a0] sm:$0xff] }
 0x34e   :  { %v3622_v7 = vpack.c.bf16 %v1387_v59, %v1383_v36  ;;  %v1411_v60 = vld [vmem:[#allocation10 + $0x1a8] sm:$0xff]  ;;  %v1412_v36 = vld [vmem:[#allocation10 + $0x1b0] sm:$0xff] }
 0x34f   :  { %v3607_v45 = vadd.f32 %v1104_v4, %v1103_v6  ;;  %v3658_v4 = vpack.c.bf16 %v1411_v60, %v1407_v56  ;;  %v1413_v6 = vld [vmem:[#allocation10 + $0x1b8] sm:$0xff] }
 0x351   :  { %2999 = vtanh.f32 %v3607_v45 }
 0x35b   :  { %v3000_v53 = vpop.eup %2999 }
 0x35c   :  { %v1111_v57 = vmul.f32 %v3000_v53, %v1109_v51  ;;  %v3660_v51 = vpack.c.bf16 %v1413_v6, %v1409_v1  ;;  %v3662_v53 = vpack.c.bf16 %v1410_v49, %v1406_v48 }
 0x35e   :  { %1113 = vst [vmem:[#allocation13 + $0x10] sm:$0xff] %v1111_v57  ;;  %1250 = vmatmul.mubr.f32.vlgmr.msra.gmra.mrb[6].mxu0 %v1111_v57  ;;  %1321 = vmatmul.mubr.f32.vlgmr.msra.gmra.mrb[6].mxu1 %v1111_v57  ;;  %v1408_v57 = vld [vmem:[#allocation10 + $0x190] sm:$0xff] }
 0x35f   :  { %2642 = vmatpush1.bf16.msra.mxu0 %v3548_v3  ;;  %2674 = vmatpush1.bf16.msra.mxu1 %v3551_v10  ;;  %v3665_v59 = vpack.c.bf16 %v1412_v36, %v1408_v57 }
 0x360   :  { %2644 = vmatprep.subr.bf16.mxu0 %v3556_v29  ;;  %2676 = vmatprep.subr.bf16.mxu1 %v3558_v42 }
 0x361   :  { %1486 = vmatprep.mubr.f32.mxu0 %v3223_v0  ;;  %1557 = vmatprep.mubr.f32.mxu1 %v3223_v0 }
 0x363   :  { %2646 = vmatpush1.bf16.msra.mxu0 %v3560_v47  ;;  %2678 = vmatpush1.bf16.msra.mxu1 %v3563_v13 }
 0x364   :  { %2648 = vmatprep.subr.bf16.mxu0 %v3568_v27  ;;  %2680 = vmatprep.subr.bf16.mxu1 %v3570_v31 }
 0x367   :  { %2650 = vmatpush1.bf16.msra.mxu0 %v3572_v32  ;;  %2682 = vmatpush1.bf16.msra.mxu1 %v3575_v44 }
 0x368   :  { %2652 = vmatprep.subr.bf16.mxu0 %v3622_v7  ;;  %2684 = vmatprep.subr.bf16.mxu1 %v3624_v25 }
 0x36b   :  { %2654 = vmatpush1.bf16.msra.mxu0 %v3626_v34  ;;  %2686 = vmatpush1.bf16.msra.mxu1 %v3629_v50 }
 0x36c   :  { %2656 = vmatprep.subr.bf16.mxu0 %v3634_v23  ;;  %2688 = vmatprep.subr.bf16.mxu1 %v3636_v37 }
 0x36f   :  { %2658 = vmatpush1.bf16.msra.mxu0 %v3638_v41  ;;  %2690 = vmatpush1.bf16.msra.mxu1 %v3641_v2 }
 0x370   :  { %2660 = vmatprep.subr.bf16.mxu0 %v3646_v15  ;;  %2692 = vmatprep.subr.bf16.mxu1 %v3648_v33 }
 0x373   :  { %2662 = vmatpush1.bf16.msra.mxu0 %v3650_v39  ;;  %2694 = vmatpush1.bf16.msra.mxu1 %v3653_v52 }
 0x374   :  { %2664 = vmatprep.subr.bf16.mxu0 %v3658_v4  ;;  %2696 = vmatprep.subr.bf16.mxu1 %v3660_v51 }
 0x377   :  { %2666 = vmatpush1.bf16.msra.mxu0 %v3662_v53  ;;  %2698 = vmatpush1.bf16.msra.mxu1 %v3665_v59 }
 0x378   :  { %2668 = vmatprep.subr.bf16.mxu0 %v3670_v22  ;;  %2700 = vmatprep.subr.bf16.mxu1 %v3672_v16 }
 0x37b   :  { %2670 = vmatpush1.bf16.msra.mxu0 %v3674_v20  ;;  %2702 = vmatpush1.bf16.msra.mxu1 %v3677_v21 }
 0x37c   :  { %2704 = vmatprep.subr.bf16.mxu0 %v3544_v55  ;;  %2736 = vmatprep.subr.bf16.mxu1 %v3546_v63 }
 0x431   :  { %v1251_v58 = vpop.f32.mrb[6].mxu0  ;;  %v1322_v61 = vpop.f32.mrb[6].mxu1 }
 0x432   :  { %v2901_v5 = vadd.f32 %v1251_v58, %v3487_v14  ;;  %v1253_v8 = vpop.f32.mrb[7].mxu0  ;;  %v1324_v11 = vpop.f32.mrb[7].mxu1  ;;  %v2917_v43 = vadd.f32 %v1322_v61, %v3492_v26 }
 0x433   :  { %v2902_v19 = vadd.f32 %v1253_v8, %v3489_v18  ;;  %v2918_v46 = vadd.f32 %v1324_v11, %v3496_v40 }
 0x434   :  { %v1331_v24 = vmul.f32 0.5, %v2901_v5 }
 0x435   :  { %v1335_v28 = vmul.f32 0.5, %v2902_v19  ;;  %v1343_v56 = vmul.f32 0.5, %v2918_v46 }
 0x436   :  { %3001 = vtanh.f32 %v1331_v24 }
 0x437   :  { %3003 = vtanh.f32 %v1335_v28 }
 0x438   :  { %3005 = vtanh.f32 %v2917_v43 }
 0x439   :  { %3007 = vtanh.f32 %v1343_v56 }
 0x440   :  { %v3002_v60 = vpop.eup %3001 }
 0x441   :  { %v3004_v1 = vpop.eup %3003  ;;  %v1333_v6 = vadd.f32 1.0, %v3002_v60 }
 0x442   :  { %v1337_v48 = vadd.f32 1.0, %v3004_v1  ;;  %v3006_v57 = vpop.eup %3005 }
 0x443   :  { %v1334_v49 = vmul.f32 0.5, %v1333_v6  ;;  %v3008_v35 = vpop.eup %3007 }
 0x444   :  { %v1338_v36 = vmul.f32 0.5, %v1337_v48  ;;  %v1345_v38 = vadd.f32 1.0, %v3008_v35 }
 0x445   :  { %v1341_v62 = vmul.f32 %v3006_v57, %v1334_v49 }
 0x446   :  { %v1340_v9 = vmul.f32 %v1338_v36, %v3607_v45  ;;  %v1346_v54 = vmul.f32 0.5, %v1345_v38 }
 0x448   :  { %v3689_v12 = vadd.f32 %v1341_v62, %v1340_v9 }
 0x44a   :  { %3009 = vtanh.f32 %v3689_v12 }
 0x454   :  { %v3010_v30 = vpop.eup %3009 }
 0x455   :  { %v1348_v17 = vmul.f32 %v3010_v30, %v1346_v54 }
 0x457   :  { %1350 = vst [vmem:[#allocation13 + $0x18] sm:$0xff] %v1348_v17  ;;  %1487 = vmatmul.mubr.f32.vlgmr.msra.gmra.mrb[8].mxu0 %v1348_v17  ;;  %1558 = vmatmul.mubr.f32.vlgmr.msra.gmra.mrb[8].mxu1 %v1348_v17 }
 0x458   :  { %2706 = vmatpush1.bf16.msra.mxu0 %v3548_v3  ;;  %2738 = vmatpush1.bf16.msra.mxu1 %v3551_v10 }
 0x459   :  { %2708 = vmatprep.subr.bf16.mxu0 %v3556_v29  ;;  %2740 = vmatprep.subr.bf16.mxu1 %v3558_v42 }
 0x45a   :  { %1723 = vmatprep.mubr.f32.mxu0 %v3223_v0  ;;  %1794 = vmatprep.mubr.f32.mxu1 %v3223_v0 }
 0x45c   :  { %2710 = vmatpush1.bf16.msra.mxu0 %v3560_v47  ;;  %2742 = vmatpush1.bf16.msra.mxu1 %v3563_v13 }
 0x45d   :  { %2712 = vmatprep.subr.bf16.mxu0 %v3568_v27  ;;  %2744 = vmatprep.subr.bf16.mxu1 %v3570_v31 }
 0x460   :  { %2714 = vmatpush1.bf16.msra.mxu0 %v3572_v32  ;;  %2746 = vmatpush1.bf16.msra.mxu1 %v3575_v44 }
 0x461   :  { %2716 = vmatprep.subr.bf16.mxu0 %v3622_v7  ;;  %2748 = vmatprep.subr.bf16.mxu1 %v3624_v25 }
 0x464   :  { %2718 = vmatpush1.bf16.msra.mxu0 %v3626_v34  ;;  %2750 = vmatpush1.bf16.msra.mxu1 %v3629_v50 }
 0x465   :  { %2720 = vmatprep.subr.bf16.mxu0 %v3634_v23  ;;  %2752 = vmatprep.subr.bf16.mxu1 %v3636_v37 }
 0x468   :  { %2722 = vmatpush1.bf16.msra.mxu0 %v3638_v41  ;;  %2754 = vmatpush1.bf16.msra.mxu1 %v3641_v2 }
 0x469   :  { %2724 = vmatprep.subr.bf16.mxu0 %v3646_v15  ;;  %2756 = vmatprep.subr.bf16.mxu1 %v3648_v33 }
 0x46c   :  { %2726 = vmatpush1.bf16.msra.mxu0 %v3650_v39  ;;  %2758 = vmatpush1.bf16.msra.mxu1 %v3653_v52 }
 0x46d   :  { %2728 = vmatprep.subr.bf16.mxu0 %v3658_v4  ;;  %2760 = vmatprep.subr.bf16.mxu1 %v3660_v51 }
 0x470   :  { %2730 = vmatpush1.bf16.msra.mxu0 %v3662_v53  ;;  %2762 = vmatpush1.bf16.msra.mxu1 %v3665_v59 }
 0x471   :  { %2732 = vmatprep.subr.bf16.mxu0 %v3670_v22  ;;  %2764 = vmatprep.subr.bf16.mxu1 %v3672_v16 }
 0x474   :  { %2734 = vmatpush1.bf16.msra.mxu0 %v3674_v20  ;;  %2766 = vmatpush1.bf16.msra.mxu1 %v3677_v21 }
 0x475   :  { %2768 = vmatprep.subr.bf16.mxu0 %v3544_v55  ;;  %2800 = vmatprep.subr.bf16.mxu1 %v3546_v63 }
 0x52a   :  { %v1488_v45 = vpop.f32.mrb[8].mxu0  ;;  %v1559_v58 = vpop.f32.mrb[8].mxu1 }
 0x52b   :  { %v2903_v61 = vadd.f32 %v1488_v45, %v3487_v14  ;;  %v1490_v5 = vpop.f32.mrb[9].mxu0  ;;  %v1561_v8 = vpop.f32.mrb[9].mxu1  ;;  %v2919_v28 = vadd.f32 %v1559_v58, %v3492_v26 }
 0x52c   :  { %v2904_v11 = vadd.f32 %v1490_v5, %v3489_v18  ;;  %v2920_v43 = vadd.f32 %v1561_v8, %v3496_v40 }
 0x52d   :  { %v1568_v19 = vmul.f32 0.5, %v2903_v61 }
 0x52e   :  { %v1572_v24 = vmul.f32 0.5, %v2904_v11  ;;  %v1580_v55 = vmul.f32 0.5, %v2920_v43 }
 0x52f   :  { %3011 = vtanh.f32 %v1568_v19 }
 0x530   :  { %3013 = vtanh.f32 %v1572_v24 }
 0x531   :  { %3015 = vtanh.f32 %v2919_v28 }
 0x532   :  { %3017 = vtanh.f32 %v1580_v55 }
 0x539   :  { %v3012_v46 = vpop.eup %3011 }
 0x53a   :  { %v3014_v63 = vpop.eup %3013  ;;  %v1570_v56 = vadd.f32 1.0, %v3012_v46 }
 0x53b   :  { %v1574_v60 = vadd.f32 1.0, %v3014_v63  ;;  %v3016_v6 = vpop.eup %3015 }
 0x53c   :  { %v1571_v1 = vmul.f32 0.5, %v1570_v56  ;;  %v3018_v62 = vpop.eup %3017  ;;  %v2070_v56 = vld [vmem:[#allocation10 + $0x8] sm:$0xff] }
 0x53d   :  { %v1575_v48 = vmul.f32 0.5, %v1574_v60  ;;  %v1582_v9 = vadd.f32 1.0, %v3018_v62  ;;  %v2074_v60 = vld [vmem:[#allocation10 + $0x28] sm:$0xff] }
 0x53e   :  { %v1578_v49 = vmul.f32 %v3016_v6, %v1571_v1  ;;  %v2072_v1 = vld [vmem:[#allocation10 + $0x18] sm:$0xff]  ;;  %v2831_v6 = vpack.c.bf16 %v2074_v60, %v2070_v56 }
 0x53f   :  { %v1577_v57 = vmul.f32 %v1575_v48, %v3689_v12  ;;  %v1583_v35 = vmul.f32 0.5, %v1582_v9  ;;  %v2076_v48 = vld [vmem:[#allocation10 + $0x38] sm:$0xff]  ;;  %v2071_v9 = vld [vmem:[#allocation10 + $0x10] sm:$0xff] }
 0x541   :  { %v3731_v36 = vadd.f32 %v1578_v49, %v1577_v57  ;;  %v2069_v49 = vld [vmem:[#allocation10] sm:$0xff] }
 0x542   :  { %v2073_v57 = vld [vmem:[#allocation10 + $0x20] sm:$0xff] }
 0x543   :  { %3019 = vtanh.f32 %v3731_v36  ;;  %v2833_v62 = vpack.c.bf16 %v2073_v57, %v2069_v49 }
 0x54d   :  { %v3020_v38 = vpop.eup %3019 }
 0x54e   :  { %v1585_v54 = vmul.f32 %v3020_v38, %v1583_v35  ;;  %v2075_v35 = vld [vmem:[#allocation10 + $0x30] sm:$0xff] }
 0x54f   :  { %v2865_v38 = vpack.c.bf16 %v2075_v35, %v2071_v9 }
 0x550   :  { %1587 = vst [vmem:[#allocation13 + $0x20] sm:$0xff] %v1585_v54  ;;  %1724 = vmatmul.mubr.f32.vlgmr.msra.gmra.mrb[10].mxu0 %v1585_v54  ;;  %1795 = vmatmul.mubr.f32.vlgmr.msra.gmra.mrb[10].mxu1 %v1585_v54  ;;  %v2078_v54 = vld [vmem:[#allocation10 + $0x48] sm:$0xff] }
 0x551   :  { %2770 = vmatpush1.bf16.msra.mxu0 %v3548_v3  ;;  %2802 = vmatpush1.bf16.msra.mxu1 %v3551_v10 }
 0x552   :  { %2772 = vmatprep.subr.bf16.mxu0 %v3556_v29  ;;  %2804 = vmatprep.subr.bf16.mxu1 %v3558_v42 }
 0x553   :  { %1960 = vmatprep.mubr.f32.mxu0 %v3223_v0  ;;  %2031 = vmatprep.mubr.f32.mxu1 %v3223_v0 }
 0x555   :  { %2774 = vmatpush1.bf16.msra.mxu0 %v3560_v47  ;;  %2806 = vmatpush1.bf16.msra.mxu1 %v3563_v13 }
 0x556   :  { %2776 = vmatprep.subr.bf16.mxu0 %v3568_v27  ;;  %2808 = vmatprep.subr.bf16.mxu1 %v3570_v31 }
 0x559   :  { %2778 = vmatpush1.bf16.msra.mxu0 %v3572_v32  ;;  %2810 = vmatpush1.bf16.msra.mxu1 %v3575_v44 }
 0x55a   :  { %2780 = vmatprep.subr.bf16.mxu0 %v3622_v7  ;;  %2812 = vmatprep.subr.bf16.mxu1 %v3624_v25 }
 0x55d   :  { %2782 = vmatpush1.bf16.msra.mxu0 %v3626_v34  ;;  %2814 = vmatpush1.bf16.msra.mxu1 %v3629_v50 }
 0x55e   :  { %2784 = vmatprep.subr.bf16.mxu0 %v3634_v23  ;;  %2816 = vmatprep.subr.bf16.mxu1 %v3636_v37 }
 0x561   :  { %2786 = vmatpush1.bf16.msra.mxu0 %v3638_v41  ;;  %2818 = vmatpush1.bf16.msra.mxu1 %v3641_v2 }
 0x562   :  { %2788 = vmatprep.subr.bf16.mxu0 %v3646_v15  ;;  %2820 = vmatprep.subr.bf16.mxu1 %v3648_v33 }
 0x565   :  { %2790 = vmatpush1.bf16.msra.mxu0 %v3650_v39  ;;  %2822 = vmatpush1.bf16.msra.mxu1 %v3653_v52 }
 0x566   :  { %2792 = vmatprep.subr.bf16.mxu0 %v3658_v4  ;;  %2824 = vmatprep.subr.bf16.mxu1 %v3660_v51 }
 0x569   :  { %2794 = vmatpush1.bf16.msra.mxu0 %v3662_v53  ;;  %2826 = vmatpush1.bf16.msra.mxu1 %v3665_v59 }
 0x56a   :  { %2796 = vmatprep.subr.bf16.mxu0 %v3670_v22  ;;  %2828 = vmatprep.subr.bf16.mxu1 %v3672_v16 }
 0x56d   :  { %2798 = vmatpush1.bf16.msra.mxu0 %v3674_v20  ;;  %2830 = vmatpush1.bf16.msra.mxu1 %v3677_v21 }
 0x56e   :  { %2832 = vmatprep.subr.bf16.mxu0 %v2831_v6 }
 0x623   :  { %v1725_v3 = vpop.f32.mrb[10].mxu0  ;;  %v1796_v10 = vpop.f32.mrb[10].mxu1 }
 0x624   :  { %v2905_v29 = vadd.f32 %v1725_v3, %v3487_v14  ;;  %v1727_v42 = vpop.f32.mrb[11].mxu0  ;;  %v1798_v47 = vpop.f32.mrb[11].mxu1  ;;  %v2921_v32 = vadd.f32 %v1796_v10, %v3492_v26  ;;  %v2082_v3 = vld [vmem:[#allocation10 + $0x68] sm:$0xff]  ;;  %v2080_v10 = vld [vmem:[#allocation10 + $0x58] sm:$0xff] }
 0x625   :  { %v2906_v13 = vadd.f32 %v1727_v42, %v3489_v18  ;;  %v2922_v44 = vadd.f32 %v1798_v47, %v3496_v40  ;;  %v2077_v42 = vld [vmem:[#allocation10 + $0x40] sm:$0xff] }
 0x626   :  { %v1805_v27 = vmul.f32 0.5, %v2905_v29  ;;  %v2084_v29 = vld [vmem:[#allocation10 + $0x78] sm:$0xff]  ;;  %v2081_v47 = vld [vmem:[#allocation10 + $0x60] sm:$0xff] }
 0x627   :  { %v1809_v31 = vmul.f32 0.5, %v2906_v13  ;;  %v1817_v12 = vmul.f32 0.5, %v2922_v44  ;;  %v2867_v13 = vpack.c.bf16 %v2084_v29, %v2080_v10 }
 0x628   :  { %3021 = vtanh.f32 %v1805_v27  ;;  %v2837_v27 = vpack.c.bf16 %v2081_v47, %v2077_v42 }
 0x629   :  { %3023 = vtanh.f32 %v1809_v31  ;;  %v2079_v31 = vld [vmem:[#allocation10 + $0x50] sm:$0xff] }
 0x62a   :  { %3025 = vtanh.f32 %v2921_v32  ;;  %v2083_v32 = vld [vmem:[#allocation10 + $0x70] sm:$0xff] }
 0x62b   :  { %3027 = vtanh.f32 %v1817_v12  ;;  %v2869_v44 = vpack.c.bf16 %v2083_v32, %v2079_v31  ;;  %v2086_v12 = vld [vmem:[#allocation10 + $0x88] sm:$0xff] }
 0x632   :  { %v3022_v30 = vpop.eup %3021 }
 0x633   :  { %v3024_v17 = vpop.eup %3023  ;;  %v1807_v45 = vadd.f32 1.0, %v3022_v30  ;;  %v2090_v30 = vld [vmem:[#allocation10 + $0xa8] sm:$0xff] }
 0x634   :  { %v1811_v58 = vadd.f32 1.0, %v3024_v17  ;;  %v3026_v5 = vpop.eup %3025  ;;  %v2088_v17 = vld [vmem:[#allocation10 + $0x98] sm:$0xff] }
 0x635   :  { %v1808_v61 = vmul.f32 0.5, %v1807_v45  ;;  %v3028_v28 = vpop.eup %3027  ;;  %v2839_v45 = vpack.c.bf16 %v2090_v30, %v2086_v12 }
 0x636   :  { %v1812_v8 = vmul.f32 0.5, %v1811_v58  ;;  %v1819_v43 = vadd.f32 1.0, %v3028_v28  ;;  %v2092_v58 = vld [vmem:[#allocation10 + $0xb8] sm:$0xff]  ;;  %v2091_v28 = vld [vmem:[#allocation10 + $0xb0] sm:$0xff] }
 0x637   :  { %v1815_v11 = vmul.f32 %v3026_v5, %v1808_v61  ;;  %v2085_v61 = vld [vmem:[#allocation10 + $0x80] sm:$0xff] }
 0x638   :  { %v1814_v19 = vmul.f32 %v1812_v8, %v3731_v36  ;;  %v1820_v55 = vmul.f32 0.5, %v1819_v43  ;;  %v2863_v36 = vpack.c.bf16 %v2076_v48, %v2072_v1  ;;  %v2089_v5 = vld [vmem:[#allocation10 + $0xa0] sm:$0xff]  ;;  %v2871_v8 = vpack.c.bf16 %v2092_v58, %v2088_v17 }
 0x63a   :  { %v3771_v24 = vadd.f32 %v1815_v11, %v1814_v19  ;;  %2864 = vmatprep.subr.bf16.mxu1 %v2863_v36  ;;  %v2841_v11 = vpack.c.bf16 %v2089_v5, %v2085_v61  ;;  %v2087_v19 = vld [vmem:[#allocation10 + $0x90] sm:$0xff] }
 0x63b   :  { %v2873_v43 = vpack.c.bf16 %v2091_v28, %v2087_v19 }
 0x63c   :  { %3029 = vtanh.f32 %v3771_v24 }
 0x646   :  { %v3030_v46 = vpop.eup %3029 }
 0x647   :  { %v1822_v63 = vmul.f32 %v3030_v46, %v1820_v55 }
 0x649   :  { %1824 = vst [vmem:[#allocation13 + $0x28] sm:$0xff] %v1822_v63  ;;  %1961 = vmatmul.mubr.f32.vlgmr.msra.gmra.mrb[12].mxu0 %v1822_v63  ;;  %2032 = vmatmul.mubr.f32.vlgmr.msra.gmra.mrb[12].mxu1 %v1822_v63 }
 0x64a   :  { %2197 = vmatprep.mubr.f32.mxu0 %v3223_v0  ;;  %2268 = vmatprep.mubr.f32.mxu1 %v3223_v0  ;;  %v2835_v0 = vpack.c.bf16 %v2082_v3, %v2078_v54 }
 0x64b   :  { %2834 = vmatpush1.bf16.msra.mxu0 %v2833_v62  ;;  %2866 = vmatpush1.bf16.msra.mxu1 %v2865_v38 }
 0x64c   :  { %2836 = vmatprep.subr.bf16.mxu0 %v2835_v0  ;;  %2868 = vmatprep.subr.bf16.mxu1 %v2867_v13 }
 0x64f   :  { %2838 = vmatpush1.bf16.msra.mxu0 %v2837_v27  ;;  %2870 = vmatpush1.bf16.msra.mxu1 %v2869_v44 }
 0x650   :  { %2840 = vmatprep.subr.bf16.mxu0 %v2839_v45  ;;  %2872 = vmatprep.subr.bf16.mxu1 %v2871_v8 }
 0x653   :  { %2842 = vmatpush1.bf16.msra.mxu0 %v2841_v11  ;;  %2874 = vmatpush1.bf16.msra.mxu1 %v2873_v43 }
 0x654   :  { %2844 = vmatprep.subr.bf16.mxu0 %v3622_v7  ;;  %2876 = vmatprep.subr.bf16.mxu1 %v3624_v25 }
 0x657   :  { %2846 = vmatpush1.bf16.msra.mxu0 %v3626_v34  ;;  %2878 = vmatpush1.bf16.msra.mxu1 %v3629_v50 }
 0x658   :  { %2848 = vmatprep.subr.bf16.mxu0 %v3634_v23  ;;  %2880 = vmatprep.subr.bf16.mxu1 %v3636_v37 }
 0x65b   :  { %2850 = vmatpush1.bf16.msra.mxu0 %v3638_v41  ;;  %2882 = vmatpush1.bf16.msra.mxu1 %v3641_v2 }
 0x65c   :  { %2852 = vmatprep.subr.bf16.mxu0 %v3646_v15  ;;  %2884 = vmatprep.subr.bf16.mxu1 %v3648_v33 }
 0x65f   :  { %2854 = vmatpush1.bf16.msra.mxu0 %v3650_v39  ;;  %2886 = vmatpush1.bf16.msra.mxu1 %v3653_v52 }
 0x660   :  { %2856 = vmatprep.subr.bf16.mxu0 %v3658_v4  ;;  %2888 = vmatprep.subr.bf16.mxu1 %v3660_v51 }
 0x663   :  { %2858 = vmatpush1.bf16.msra.mxu0 %v3662_v53  ;;  %2890 = vmatpush1.bf16.msra.mxu1 %v3665_v59 }
 0x664   :  { %2860 = vmatprep.subr.bf16.mxu0 %v3670_v22  ;;  %2892 = vmatprep.subr.bf16.mxu1 %v3672_v16 }
 0x667   :  { %2862 = vmatpush1.bf16.msra.mxu0 %v3674_v20  ;;  %2894 = vmatpush1.bf16.msra.mxu1 %v3677_v21 }
 0x71c   :  { %v1962_v7 = vpop.f32.mrb[12].mxu0  ;;  %v2033_v25 = vpop.f32.mrb[12].mxu1 }
 0x71d   :  { %v2907_v34 = vadd.f32 %v1962_v7, %v3487_v14  ;;  %v1964_v50 = vpop.f32.mrb[13].mxu0  ;;  %v2035_v23 = vpop.f32.mrb[13].mxu1  ;;  %v2923_v15 = vadd.f32 %v2033_v25, %v3492_v26 }
 0x71e   :  { %v2908_v37 = vadd.f32 %v1964_v50, %v3489_v18  ;;  %v2924_v33 = vadd.f32 %v2035_v23, %v3496_v40 }
 0x71f   :  { %v2042_v41 = vmul.f32 0.5, %v2907_v34 }
 0x720   :  { %v2046_v2 = vmul.f32 0.5, %v2908_v37  ;;  %v2054_v39 = vmul.f32 0.5, %v2924_v33 }
 0x721   :  { %3031 = vtanh.f32 %v2042_v41 }
 0x722   :  { %3033 = vtanh.f32 %v2046_v2 }
 0x723   :  { %3035 = vtanh.f32 %v2923_v15 }
 0x724   :  { %3037 = vtanh.f32 %v2054_v39 }
 0x72b   :  { %v3032_v52 = vpop.eup %3031 }
 0x72c   :  { %v3034_v4 = vpop.eup %3033  ;;  %v2044_v51 = vadd.f32 1.0, %v3032_v52 }
 0x72d   :  { %v2048_v53 = vadd.f32 1.0, %v3034_v4  ;;  %v3036_v22 = vpop.eup %3035 }
 0x72e   :  { %v2045_v59 = vmul.f32 0.5, %v2044_v51  ;;  %v3038_v46 = vpop.eup %3037 }
 0x72f   :  { %v2049_v16 = vmul.f32 0.5, %v2048_v53  ;;  %v2056_v63 = vadd.f32 1.0, %v3038_v46 }
 0x730   :  { %v2052_v20 = vmul.f32 %v3036_v22, %v2045_v59 }
 0x731   :  { %v2051_v21 = vmul.f32 %v2049_v16, %v3771_v24  ;;  %v2057_v56 = vmul.f32 0.5, %v2056_v63 }
 0x733   :  { %v2053_v55 = vadd.f32 %v2052_v20, %v2051_v21 }
 0x735   :  { %3039 = vtanh.f32 %v2053_v55 }
 0x73f   :  { %v3040_v60 = vpop.eup %3039 }
 0x740   :  { %v2059_v1 = vmul.f32 %v3040_v60, %v2057_v56 }
 0x742   :  { %2061 = vst [vmem:[#allocation13 + $0x30] sm:$0xff] %v2059_v1  ;;  %2198 = vmatmul.mubr.f32.vlgmr.msra.gmra.mrb[14].mxu0 %v2059_v1  ;;  %2269 = vmatmul.mubr.f32.vlgmr.msra.gmra.mrb[14].mxu1 %v2059_v1 }
 0x815   :  { %v2199_v6 = vpop.f32.mrb[14].mxu0  ;;  %v2270_v48 = vpop.f32.mrb[14].mxu1 }
 0x816   :  { %v2909_v49 = vadd.f32 %v2199_v6, %v3487_v14  ;;  %v2201_v57 = vpop.f32.mrb[15].mxu0  ;;  %v2272_v36 = vpop.f32.mrb[15].mxu1  ;;  %v2925_v35 = vadd.f32 %v2270_v48, %v3492_v26 }
 0x817   :  { %v2910_v62 = vadd.f32 %v2201_v57, %v3489_v18  ;;  %v2926_v38 = vadd.f32 %v2272_v36, %v3496_v40 }
 0x818   :  { %v2279_v9 = vmul.f32 0.5, %v2909_v49 }
 0x819   :  { %v2283_v24 = vmul.f32 0.5, %v2910_v62  ;;  %v2291_v54 = vmul.f32 0.5, %v2926_v38 }
 0x81a   :  { %3041 = vtanh.f32 %v2279_v9 }
 0x81b   :  { %3043 = vtanh.f32 %v2283_v24 }
 0x81c   :  { %3045 = vtanh.f32 %v2925_v35 }
 0x81d   :  { %3047 = vtanh.f32 %v2291_v54 }
 0x824   :  { %v3042_v3 = vpop.eup %3041 }
 0x825   :  { %v3044_v10 = vpop.eup %3043  ;;  %v2281_v0 = vadd.f32 1.0, %v3042_v3 }
 0x826   :  { %v2285_v29 = vadd.f32 1.0, %v3044_v10  ;;  %v3046_v42 = vpop.eup %3045 }
 0x827   :  { %v2282_v14 = vmul.f32 0.5, %v2281_v0  ;;  %v3048_v31 = vpop.eup %3047 }
 0x828   :  { %v2286_v47 = vmul.f32 0.5, %v2285_v29  ;;  %v2293_v26 = vadd.f32 1.0, %v3048_v31 }
 0x829   :  { %v2289_v13 = vmul.f32 %v3046_v42, %v2282_v14 }
 0x82a   :  { %v2288_v18 = vmul.f32 %v2286_v47, %v2053_v55  ;;  %v2294_v32 = vmul.f32 0.5, %v2293_v26 }
 0x82c   :  { %v2290_v27 = vadd.f32 %v2289_v13, %v2288_v18 }
 0x82e   :  { %3049 = vtanh.f32 %v2290_v27  ;;  %2305 = vst [vmem:[#allocation16] sm:$0xff] %v2290_v27 }
 0x838   :  { %v3050_v40 = vpop.eup %3049 }
 0x839   :  { %v2296_v44 = vmul.f32 %v3050_v40, %v2294_v32 }
 0x83b   :  { %2298 = vst [vmem:[#allocation13 + $0x38] sm:$0xff] %v2296_v44  ;;  %2304 = vst [vmem:[#allocation14] sm:$0xff] %v2296_v44 }
 0x83c   :  { %3150 = shalt.err (!%p3147_p8)
}
 0x83d   :  { %s3151_s9 = scalar_lea.hbm %s3863_s5, 128 }
 0x83e   :  { %p3152_p9 = scmp.ne.s32.totalorder %s3863_s5, %s3151_s9  ;;  %p3155_p10 = scmp.lt.u32.totalorder %s3151_s9, %s3863_s5 }
 0x840   :  { %p3157_p11 = pnand %p3155_p10, %p3152_p9 }
 0x842   :  { %3160 = shalt.err (!%p3157_p11)
}
 0x843   :  { %2327 = dma.vmem_to_hbm [thread:$0]  %s2325_s8, 128, %s3863_s5, [#allocation15]  }
 0x844   :  { %s3161_s15 = scalar_lea.vmem %s3805_s25, 1024  ;;  %p3166_p13 = scmp.lt.s32.totalorder %s3805_s25, %s3805_s25 }
 0x845   :  { %p3162_p12 = scmp.ne.s32.totalorder %s3805_s25, %s3161_s15  ;;  %p3167_p0 = scmp.lt.s32.totalorder %s3161_s15, %s3161_s15 }
 0x847   :  { %p3168_p1 = por %p3167_p0, %p3166_p13 }
 0x849   :  { %p3169_p2 = pnand %p3168_p1, %p3162_p12 }
 0x84b   :  { %3172 = shalt.err (!%p3169_p2)
}
 0x84c   :  { %s3173_s18 = scalar_lea.hbm %s3862_s4, 1024 }
 0x84d   :  { %p3174_p3 = scmp.ne.s32.totalorder %s3862_s4, %s3173_s18  ;;  %p3177_p4 = scmp.lt.u32.totalorder %s3173_s18, %s3862_s4 }
 0x84f   :  { %p3179_p5 = pnand %p3177_p4, %p3174_p3 }
 0x851   :  { %3182 = shalt.err (!%p3179_p5)
}
 0x852   :  { %2317 = dma.vmem_to_hbm [thread:$0]  %s3805_s25, 1024, %s3862_s4, [#allocation7], %s3219_s1, %s3219_s1, %s3220_s21  }
 0x853   :  { %s3183_s7 = scalar_lea.vmem %s3807_s27, 128  ;;  %p3188_p7 = scmp.lt.s32.totalorder %s3807_s27, %s3807_s27 }
 0x854   :  { %p3184_p6 = scmp.ne.s32.totalorder %s3807_s27, %s3183_s7  ;;  %p3189_p8 = scmp.lt.s32.totalorder %s3183_s7, %s3183_s7 }
 0x856   :  { %p3190_p9 = por %p3189_p8, %p3188_p7 }
 0x858   :  { %p3191_p10 = pnand %p3190_p9, %p3184_p6 }
 0x85a   :  { %3194 = shalt.err (!%p3191_p10)
}
 0x85b   :  { %s3195_s24 = scalar_lea.hbm %s3864_s6, 128 }
 0x85c   :  { %p3196_p11 = scmp.ne.s32.totalorder %s3864_s6, %s3195_s24  ;;  %p3199_p12 = scmp.lt.u32.totalorder %s3195_s24, %s3864_s6 }
 0x85e   :  { %p3201_p13 = pnand %p3199_p12, %p3196_p11 }
 0x860   :  { %3204 = shalt.err (!%p3201_p13)
}
 0x861   :  { %2337 = dma.vmem_to_hbm [thread:$0]  %s3807_s27, 128, %s3864_s6, [#allocation15]  }
 0x862   :  { %3211 = dma.done.wait [#allocation7], 1024  }
 0x863   :  { %3212 = vsyncadd [#allocation7], 4294966272 }
 0x864   :  { %3213 = dma.done.wait [#allocation15], 256  }
 0x865   :  { %3214 = vsyncadd [#allocation15], 4294967040 }
 0x866   :  { %2347 = vsyncpa [#allocation6], 1 }
 0x867   :  { %2348 = vsyncpa [#allocation9], 1 }
 0x868   :  { %2349 = vsyncpa [#allocation12], 1 }
 0x869   :  { %2350 = vsyncpa [#allocation7], 1 }
 0x86a   :  { %2351 = vsyncpa [#allocation15], 1 }

</bundles_post_ra>
